<compile_context>
chip_gen: v5e
topology: v5e:2x2
jax: 0.10.0
libtpu: 0.0.40
codegen_flags: <defaults>
</compile_context>

<pallas_src>
import math

import jax
import jax.numpy as jnp
from jax.experimental import pallas as pl
from jax.experimental.pallas import tpu as pltpu

# ----------------------------- small synthetic config ------------------------------
VOCAB = 100
B = 2              # batch
S = 8              # sequence length (pad_size, small)
H = 32             # hidden_size (BERT's 768, shrunk)
NUM_HEADS = 4
HEAD_DIM = H // NUM_HEADS
INTERMEDIATE = 64
NUM_LAYERS = 2
NUM_CLASSES = 2    # len(key) == 2
LN_EPS = 1e-12

# whole-array-in-VMEM spec (no grid) — the entire model fits in VMEM
VMEM_SPEC = pl.BlockSpec(memory_space=pltpu.MemorySpace.VMEM)


# ------------------------------- fused Pallas kernel --------------------------------
def _bert_fused_kernel(emb_ref, mask_ref,
                       emb_g_ref, emb_b_ref,
                       wqkv_ref, bqkv_ref, wo_ref, bo_ref,
                       ln1_g_ref, ln1_b_ref, w1_ref, b1_ref, w2_ref, b2_ref,
                       ln2_g_ref, ln2_b_ref,
                       pool_w_ref, pool_b_ref, fc_w_ref, fc_b_ref,
                       out_ref):
    """Whole BERT classifier forward on VMEM-resident tensors.

    emb_ref : [B*S, H]   word+pos+type embedding sum (pre-LayerNorm)
    mask_ref: [B, S]     attention mask (1 = valid, 0 = pad), float32
    weights : stacked with a leading NUM_LAYERS dim where per-layer
    out_ref : [B, NUM_CLASSES] logits
    """
    f32 = jnp.float32
    b_n, s_n = mask_ref.shape
    hid = emb_ref.shape[-1]
    head_dim = hid // NUM_HEADS
    scale = 1.0 / math.sqrt(head_dim)

    def layernorm(v, g, b):
        mean = jnp.mean(v, axis=-1, keepdims=True)
        var = jnp.mean(jnp.square(v - mean), axis=-1, keepdims=True)
        return (v - mean) * jax.lax.rsqrt(var + LN_EPS) * g + b

    def gelu(v):
        # tanh-approx GELU (original TF-BERT formulation); routes to EUP instead of a
        # VPU erf polynomial.  Differs from erf-GELU by < 1e-3.
        c = math.sqrt(2.0 / math.pi)
        return 0.5 * v * (1.0 + jnp.tanh(c * (v + 0.044715 * v * v * v)))

    # ---- embedding LayerNorm (no zero add, no separate launch) ----
    x = layernorm(emb_ref[...].astype(f32), emb_g_ref[...], emb_b_ref[...])   # [B*S, H]

    # additive key-position bias, built in-kernel from the raw mask: [B, S]
    key_bias = (1.0 - mask_ref[...].astype(f32)) * -10000.0

    # ---- encoder layers, fully unrolled (NUM_LAYERS is tiny) ----
    for l in range(NUM_LAYERS):
        # fused QKV projection: one [B*S, H] x [H, 3H] MXU matmul
        qkv = jnp.dot(x, wqkv_ref[l], preferred_element_type=f32) + bqkv_ref[l]
        q = qkv[:, 0 * hid:1 * hid]
        k = qkv[:, 1 * hid:2 * hid]
        v = qkv[:, 2 * hid:3 * hid]

        # attention for all (batch, head) pairs inside this single kernel invocation;
        # static unroll — no grid steps, no HBM round-trips, relayout stays in vregs.
        ctx_rows = []
        for b in range(b_n):
            r0 = b * s_n
            bias_b = key_bias[b:b + 1, :]                        # [1, S] -> bcast over queries
            heads = []
            for h in range(NUM_HEADS):
                c0 = h * head_dim
                qh = q[r0:r0 + s_n, c0:c0 + head_dim]            # [S, d]
                kh = k[r0:r0 + s_n, c0:c0 + head_dim]
                vh = v[r0:r0 + s_n, c0:c0 + head_dim]
                s = jax.lax.dot_general(qh, kh, (((1,), (1,)), ((), ())),
                                        preferred_element_type=f32) * scale + bias_b
                m = jnp.max(s, axis=-1, keepdims=True)
                p = jnp.exp(s - m)
                p = p * pl.reciprocal(jnp.sum(p, axis=-1, keepdims=True), approx=True)
                heads.append(jnp.dot(p, vh, preferred_element_type=f32))
            ctx_rows.append(jnp.concatenate(heads, axis=-1))      # [S, H]
        ctx = jnp.concatenate(ctx_rows, axis=0)                   # [B*S, H]

        # output projection + residual LayerNorm
        attn_out = jnp.dot(ctx, wo_ref[l], preferred_element_type=f32) + bo_ref[l]
        x = layernorm(x + attn_out, ln1_g_ref[l], ln1_b_ref[l])

        # feed-forward + residual LayerNorm
        ff = gelu(jnp.dot(x, w1_ref[l], preferred_element_type=f32) + b1_ref[l])
        ff = jnp.dot(ff, w2_ref[l], preferred_element_type=f32) + b2_ref[l]
        x = layernorm(x + ff, ln2_g_ref[l], ln2_b_ref[l])

    # ---- BERT pooler on the [CLS] token, then classifier head ----
    cls = jnp.concatenate([x[b * s_n:b * s_n + 1, :] for b in range(b_n)], axis=0)   # [B, H]
    pooled = jnp.tanh(jnp.dot(cls, pool_w_ref[...], preferred_element_type=f32)
                      + pool_b_ref[...])
    logits = jnp.dot(pooled, fc_w_ref[...], preferred_element_type=f32) + fc_b_ref[...]
    out_ref[...] = logits.astype(out_ref.dtype)


# --------------------------------- parameter setup ----------------------------------
def init_params(key):
    """Parameters, pre-packed for the fused kernel (QKV concatenated, layers stacked)."""
    def nrm(k, shape):
        return jax.random.normal(k, shape, jnp.float32) * 0.02

    def zeros(*s):
        return jnp.zeros(s, jnp.float32)

    def ones(*s):
        return jnp.ones(s, jnp.float32)

    keys = iter(jax.random.split(key, 64))

    wqkv, bqkv, wo, bo = [], [], [], []
    ln1_g, ln1_b, w1, b1, w2, b2, ln2_g, ln2_b = [], [], [], [], [], [], [], []
    for _ in range(NUM_LAYERS):
        wq, wk, wv = (nrm(next(keys), (H, H)) for _ in range(3))
        wqkv.append(jnp.concatenate([wq, wk, wv], axis=1))        # [H, 3H]
        bqkv.append(zeros(1, 3 * H))
        wo.append(nrm(next(keys), (H, H))); bo.append(zeros(1, H))
        ln1_g.append(ones(1, H)); ln1_b.append(zeros(1, H))
        w1.append(nrm(next(keys), (H, INTERMEDIATE))); b1.append(zeros(1, INTERMEDIATE))
        w2.append(nrm(next(keys), (INTERMEDIATE, H))); b2.append(zeros(1, H))
        ln2_g.append(ones(1, H)); ln2_b.append(zeros(1, H))

    return {
        "word_emb": nrm(next(keys), (VOCAB, H)),
        "pos_emb": nrm(next(keys), (S, H)),
        "type_emb": nrm(next(keys), (2, H)),
        "emb_ln_g": ones(1, H), "emb_ln_b": zeros(1, H),
        "wqkv": jnp.stack(wqkv), "bqkv": jnp.stack(bqkv),
        "wo": jnp.stack(wo), "bo": jnp.stack(bo),
        "ln1_g": jnp.stack(ln1_g), "ln1_b": jnp.stack(ln1_b),
        "w1": jnp.stack(w1), "b1": jnp.stack(b1),
        "w2": jnp.stack(w2), "b2": jnp.stack(b2),
        "ln2_g": jnp.stack(ln2_g), "ln2_b": jnp.stack(ln2_b),
        "pool_w": nrm(next(keys), (H, H)), "pool_b": zeros(1, H),
        "fc_w": nrm(next(keys), (H, NUM_CLASSES)), "fc_b": zeros(1, NUM_CLASSES),
    }


# ------------------------------------ forward ---------------------------------------
def bert_classifier(params, token_ids, mask):
    """Equivalent of Model.forward((context, mask)) -> logits [B, num_classes]."""
    b_, s_ = token_ids.shape

    # Token-id embedding gather stays in XLA (data-dependent row gather); the cheap
    # word + position + token_type add fuses with it.  Everything else is one kernel.
    word = jnp.take(params["word_emb"], token_ids, axis=0)                      # [B, S, H]
    emb = (word + params["pos_emb"][None, :s_, :]
           + params["type_emb"][0][None, None, :]).reshape(b_ * s_, H)          # [B*S, H]
    mask_f = mask.astype(jnp.float32)                                           # [B, S]

    return pl.pallas_call(
        _bert_fused_kernel,
        out_shape=jax.ShapeDtypeStruct((b_, NUM_CLASSES), jnp.float32),
        in_specs=[VMEM_SPEC] * 20,
        out_specs=VMEM_SPEC,
    )(emb, mask_f,
      params["emb_ln_g"], params["emb_ln_b"],
      params["wqkv"], params["bqkv"], params["wo"], params["bo"],
      params["ln1_g"], params["ln1_b"],
      params["w1"], params["b1"], params["w2"], params["b2"],
      params["ln2_g"], params["ln2_b"],
      params["pool_w"], params["pool_b"], params["fc_w"], params["fc_b"])


# ------------------------------------- main ------------------------------------------
if __name__ == "__main__":
    root = jax.random.PRNGKey(0)
    k_param, k_tok = jax.random.split(root)

    params = init_params(k_param)

    token_ids = jax.random.randint(k_tok, (B, S), 0, VOCAB, dtype=jnp.int32)
    # mask: first sequence fully valid, second has 2 padding positions
    mask = jnp.array([[1] * S, [1] * (S - 2) + [0] * 2], dtype=jnp.int32)

    fwd = jax.jit(bert_classifier)
    logits = fwd(params, token_ids, mask)
    jax.block_until_ready(logits)

    assert logits.shape == (B, NUM_CLASSES)
    assert bool(jnp.all(jnp.isfinite(logits)))
    print("KERNEL_OK")
</pallas_src>

<mosaic_0001>
module attributes {stable_mosaic.version = 11 : i64} {
  func.func @_bert_fused_kernel(%arg0: memref<16x32xf32, #tpu.memory_space<vmem>>, %arg1: memref<2x8xf32, #tpu.memory_space<vmem>>, %arg2: memref<1x32xf32, #tpu.memory_space<vmem>>, %arg3: memref<1x32xf32, #tpu.memory_space<vmem>>, %arg4: memref<2x32x96xf32, #tpu.memory_space<vmem>>, %arg5: memref<2x1x96xf32, #tpu.memory_space<vmem>>, %arg6: memref<2x32x32xf32, #tpu.memory_space<vmem>>, %arg7: memref<2x1x32xf32, #tpu.memory_space<vmem>>, %arg8: memref<2x1x32xf32, #tpu.memory_space<vmem>>, %arg9: memref<2x1x32xf32, #tpu.memory_space<vmem>>, %arg10: memref<2x32x64xf32, #tpu.memory_space<vmem>>, %arg11: memref<2x1x64xf32, #tpu.memory_space<vmem>>, %arg12: memref<2x64x32xf32, #tpu.memory_space<vmem>>, %arg13: memref<2x1x32xf32, #tpu.memory_space<vmem>>, %arg14: memref<2x1x32xf32, #tpu.memory_space<vmem>>, %arg15: memref<2x1x32xf32, #tpu.memory_space<vmem>>, %arg16: memref<32x32xf32, #tpu.memory_space<vmem>>, %arg17: memref<1x32xf32, #tpu.memory_space<vmem>>, %arg18: memref<32x2xf32, #tpu.memory_space<vmem>>, %arg19: memref<1x2xf32, #tpu.memory_space<vmem>>, %arg20: memref<2x2xf32, #tpu.memory_space<vmem>>) attributes {dimension_semantics = [], scalar_prefetch = 0 : i64, scratch_operands = 0 : i64, tpu.core_type = #tpu.core_type<tc>} {
    %c0 = arith.constant 0 : index
    %c0_0 = arith.constant 0 : index
    %0 = vector.load %arg0[%c0, %c0_0] : memref<16x32xf32, #tpu.memory_space<vmem>>, vector<16x32xf32>
    %c0_1 = arith.constant 0 : index
    %c0_2 = arith.constant 0 : index
    %1 = vector.load %arg2[%c0_1, %c0_2] : memref<1x32xf32, #tpu.memory_space<vmem>>, vector<1x32xf32>
    %c0_3 = arith.constant 0 : index
    %c0_4 = arith.constant 0 : index
    %2 = vector.load %arg3[%c0_3, %c0_4] : memref<1x32xf32, #tpu.memory_space<vmem>>, vector<1x32xf32>
    %cst = arith.constant dense<0.000000e+00> : vector<16xf32>
    %3 = vector.multi_reduction <add>, %0, %cst [1] : vector<16x32xf32> to vector<16xf32>
    %4 = vector.shape_cast %3 : vector<16xf32> to vector<16x1xf32>
    %cst_5 = arith.constant 3.200000e+01 : f32
    %5 = vector.broadcast %cst_5 : f32 to vector<16x1xf32>
    %6 = arith.divf %4, %5 : vector<16x1xf32>
    %7 = vector.broadcast %6 : vector<16x1xf32> to vector<16x32xf32>
    %8 = arith.subf %0, %7 : vector<16x32xf32>
    %9 = arith.mulf %8, %8 : vector<16x32xf32>
    %cst_6 = arith.constant dense<0.000000e+00> : vector<16xf32>
    %10 = vector.multi_reduction <add>, %9, %cst_6 [1] : vector<16x32xf32> to vector<16xf32>
    %11 = vector.shape_cast %10 : vector<16xf32> to vector<16x1xf32>
    %cst_7 = arith.constant 3.200000e+01 : f32
    %12 = vector.broadcast %cst_7 : f32 to vector<16x1xf32>
    %13 = arith.divf %11, %12 : vector<16x1xf32>
    %14 = vector.broadcast %6 : vector<16x1xf32> to vector<16x32xf32>
    %15 = arith.subf %0, %14 : vector<16x32xf32>
    %cst_8 = arith.constant 9.99999996E-13 : f32
    %16 = vector.broadcast %cst_8 : f32 to vector<16x1xf32>
    %17 = arith.addf %13, %16 : vector<16x1xf32>
    %18 = math.rsqrt %17 : vector<16x1xf32>
    %19 = vector.broadcast %18 : vector<16x1xf32> to vector<16x32xf32>
    %20 = arith.mulf %15, %19 : vector<16x32xf32>
    %21 = vector.broadcast %1 : vector<1x32xf32> to vector<16x32xf32>
    %22 = arith.mulf %20, %21 : vector<16x32xf32>
    %23 = vector.broadcast %2 : vector<1x32xf32> to vector<16x32xf32>
    %24 = arith.addf %22, %23 : vector<16x32xf32>
    %c0_9 = arith.constant 0 : index
    %c0_10 = arith.constant 0 : index
    %25 = vector.load %arg1[%c0_9, %c0_10] : memref<2x8xf32, #tpu.memory_space<vmem>>, vector<2x8xf32>
    %cst_11 = arith.constant 1.000000e+00 : f32
    %26 = vector.broadcast %cst_11 : f32 to vector<2x8xf32>
    %27 = arith.subf %26, %25 : vector<2x8xf32>
    %cst_12 = arith.constant -1.000000e+04 : f32
    %28 = vector.broadcast %cst_12 : f32 to vector<2x8xf32>
    %29 = arith.mulf %27, %28 : vector<2x8xf32>
    %c0_13 = arith.constant 0 : index
    %c0_14 = arith.constant 0 : index
    %c0_15 = arith.constant 0 : index
    %30 = vector.load %arg4[%c0_13, %c0_14, %c0_15] : memref<2x32x96xf32, #tpu.memory_space<vmem>>, vector<1x32x96xf32>
    %31 = vector.shape_cast %30 : vector<1x32x96xf32> to vector<32x96xf32>
    %cst_16 = arith.constant dense<0.000000e+00> : vector<16x96xf32>
    %32 = tpu.matmul %24, %31, %cst_16 {dimension_numbers = #tpu.dot_dimension_numbers<[1], [0], [0], [1], [0, 0, 1, 1], [], []>} : vector<16x32xf32>, vector<32x96xf32>, vector<16x96xf32> -> vector<16x96xf32>
    %c0_17 = arith.constant 0 : index
    %c0_18 = arith.constant 0 : index
    %c0_19 = arith.constant 0 : index
    %33 = vector.load %arg5[%c0_17, %c0_18, %c0_19] : memref<2x1x96xf32, #tpu.memory_space<vmem>>, vector<1x1x96xf32>
    %34 = vector.shape_cast %33 : vector<1x1x96xf32> to vector<1x96xf32>
    %35 = vector.broadcast %34 : vector<1x96xf32> to vector<16x96xf32>
    %36 = arith.addf %32, %35 : vector<16x96xf32>
    %37 = vector.extract_strided_slice %36 {offsets = [0, 0], sizes = [16, 32], strides = [1, 1]} : vector<16x96xf32> to vector<16x32xf32>
    %38 = vector.extract_strided_slice %36 {offsets = [0, 32], sizes = [16, 32], strides = [1, 1]} : vector<16x96xf32> to vector<16x32xf32>
    %39 = vector.extract_strided_slice %36 {offsets = [0, 64], sizes = [16, 32], strides = [1, 1]} : vector<16x96xf32> to vector<16x32xf32>
    %40 = vector.extract_strided_slice %29 {offsets = [0, 0], sizes = [1, 8], strides = [1, 1]} : vector<2x8xf32> to vector<1x8xf32>
    %41 = vector.extract_strided_slice %37 {offsets = [0, 0], sizes = [8, 8], strides = [1, 1]} : vector<16x32xf32> to vector<8x8xf32>
    %42 = vector.extract_strided_slice %38 {offsets = [0, 0], sizes = [8, 8], strides = [1, 1]} : vector<16x32xf32> to vector<8x8xf32>
    %43 = vector.extract_strided_slice %39 {offsets = [0, 0], sizes = [8, 8], strides = [1, 1]} : vector<16x32xf32> to vector<8x8xf32>
    %cst_20 = arith.constant dense<0.000000e+00> : vector<8x8xf32>
    %44 = tpu.matmul %41, %42, %cst_20 {dimension_numbers = #tpu.dot_dimension_numbers<[1], [1], [0], [0], [0, 0, 1, 0], [], []>} : vector<8x8xf32>, vector<8x8xf32>, vector<8x8xf32> -> vector<8x8xf32>
    %cst_21 = arith.constant 0.353553385 : f32
    %45 = vector.broadcast %cst_21 : f32 to vector<8x8xf32>
    %46 = arith.mulf %44, %45 : vector<8x8xf32>
    %47 = vector.broadcast %40 : vector<1x8xf32> to vector<8x8xf32>
    %48 = arith.addf %46, %47 : vector<8x8xf32>
    %cst_22 = arith.constant dense<0xFF800000> : vector<8xf32>
    %49 = vector.multi_reduction <maximumf>, %48, %cst_22 [1] : vector<8x8xf32> to vector<8xf32>
    %50 = vector.shape_cast %49 : vector<8xf32> to vector<8x1xf32>
    %51 = vector.broadcast %50 : vector<8x1xf32> to vector<8x8xf32>
    %52 = arith.subf %48, %51 : vector<8x8xf32>
    %53 = math.exp %52 : vector<8x8xf32>
    %cst_23 = arith.constant dense<0.000000e+00> : vector<8xf32>
    %54 = vector.multi_reduction <add>, %53, %cst_23 [1] : vector<8x8xf32> to vector<8xf32>
    %55 = vector.shape_cast %54 : vector<8xf32> to vector<8x1xf32>
    %56 = tpu.reciprocal %55 {approx = true} : vector<8x1xf32> -> vector<8x1xf32>
    %57 = vector.broadcast %56 : vector<8x1xf32> to vector<8x8xf32>
    %58 = arith.mulf %53, %57 : vector<8x8xf32>
    %cst_24 = arith.constant dense<0.000000e+00> : vector<8x8xf32>
    %59 = tpu.matmul %58, %43, %cst_24 {dimension_numbers = #tpu.dot_dimension_numbers<[1], [0], [0], [1], [0, 0, 1, 1], [], []>} : vector<8x8xf32>, vector<8x8xf32>, vector<8x8xf32> -> vector<8x8xf32>
    %60 = vector.extract_strided_slice %37 {offsets = [0, 8], sizes = [8, 8], strides = [1, 1]} : vector<16x32xf32> to vector<8x8xf32>
    %61 = vector.extract_strided_slice %38 {offsets = [0, 8], sizes = [8, 8], strides = [1, 1]} : vector<16x32xf32> to vector<8x8xf32>
    %62 = vector.extract_strided_slice %39 {offsets = [0, 8], sizes = [8, 8], strides = [1, 1]} : vector<16x32xf32> to vector<8x8xf32>
    %cst_25 = arith.constant dense<0.000000e+00> : vector<8x8xf32>
    %63 = tpu.matmul %60, %61, %cst_25 {dimension_numbers = #tpu.dot_dimension_numbers<[1], [1], [0], [0], [0, 0, 1, 0], [], []>} : vector<8x8xf32>, vector<8x8xf32>, vector<8x8xf32> -> vector<8x8xf32>
    %cst_26 = arith.constant 0.353553385 : f32
    %64 = vector.broadcast %cst_26 : f32 to vector<8x8xf32>
    %65 = arith.mulf %63, %64 : vector<8x8xf32>
    %66 = vector.broadcast %40 : vector<1x8xf32> to vector<8x8xf32>
    %67 = arith.addf %65, %66 : vector<8x8xf32>
    %cst_27 = arith.constant dense<0xFF800000> : vector<8xf32>
    %68 = vector.multi_reduction <maximumf>, %67, %cst_27 [1] : vector<8x8xf32> to vector<8xf32>
    %69 = vector.shape_cast %68 : vector<8xf32> to vector<8x1xf32>
    %70 = vector.broadcast %69 : vector<8x1xf32> to vector<8x8xf32>
    %71 = arith.subf %67, %70 : vector<8x8xf32>
    %72 = math.exp %71 : vector<8x8xf32>
    %cst_28 = arith.constant dense<0.000000e+00> : vector<8xf32>
    %73 = vector.multi_reduction <add>, %72, %cst_28 [1] : vector<8x8xf32> to vector<8xf32>
    %74 = vector.shape_cast %73 : vector<8xf32> to vector<8x1xf32>
    %75 = tpu.reciprocal %74 {approx = true} : vector<8x1xf32> -> vector<8x1xf32>
    %76 = vector.broadcast %75 : vector<8x1xf32> to vector<8x8xf32>
    %77 = arith.mulf %72, %76 : vector<8x8xf32>
    %cst_29 = arith.constant dense<0.000000e+00> : vector<8x8xf32>
    %78 = tpu.matmul %77, %62, %cst_29 {dimension_numbers = #tpu.dot_dimension_numbers<[1], [0], [0], [1], [0, 0, 1, 1], [], []>} : vector<8x8xf32>, vector<8x8xf32>, vector<8x8xf32> -> vector<8x8xf32>
    %79 = vector.extract_strided_slice %37 {offsets = [0, 16], sizes = [8, 8], strides = [1, 1]} : vector<16x32xf32> to vector<8x8xf32>
    %80 = vector.extract_strided_slice %38 {offsets = [0, 16], sizes = [8, 8], strides = [1, 1]} : vector<16x32xf32> to vector<8x8xf32>
    %81 = vector.extract_strided_slice %39 {offsets = [0, 16], sizes = [8, 8], strides = [1, 1]} : vector<16x32xf32> to vector<8x8xf32>
    %cst_30 = arith.constant dense<0.000000e+00> : vector<8x8xf32>
    %82 = tpu.matmul %79, %80, %cst_30 {dimension_numbers = #tpu.dot_dimension_numbers<[1], [1], [0], [0], [0, 0, 1, 0], [], []>} : vector<8x8xf32>, vector<8x8xf32>, vector<8x8xf32> -> vector<8x8xf32>
    %cst_31 = arith.constant 0.353553385 : f32
    %83 = vector.broadcast %cst_31 : f32 to vector<8x8xf32>
    %84 = arith.mulf %82, %83 : vector<8x8xf32>
    %85 = vector.broadcast %40 : vector<1x8xf32> to vector<8x8xf32>
    %86 = arith.addf %84, %85 : vector<8x8xf32>
    %cst_32 = arith.constant dense<0xFF800000> : vector<8xf32>
    %87 = vector.multi_reduction <maximumf>, %86, %cst_32 [1] : vector<8x8xf32> to vector<8xf32>
    %88 = vector.shape_cast %87 : vector<8xf32> to vector<8x1xf32>
    %89 = vector.broadcast %88 : vector<8x1xf32> to vector<8x8xf32>
    %90 = arith.subf %86, %89 : vector<8x8xf32>
    %91 = math.exp %90 : vector<8x8xf32>
    %cst_33 = arith.constant dense<0.000000e+00> : vector<8xf32>
    %92 = vector.multi_reduction <add>, %91, %cst_33 [1] : vector<8x8xf32> to vector<8xf32>
    %93 = vector.shape_cast %92 : vector<8xf32> to vector<8x1xf32>
    %94 = tpu.reciprocal %93 {approx = true} : vector<8x1xf32> -> vector<8x1xf32>
    %95 = vector.broadcast %94 : vector<8x1xf32> to vector<8x8xf32>
    %96 = arith.mulf %91, %95 : vector<8x8xf32>
    %cst_34 = arith.constant dense<0.000000e+00> : vector<8x8xf32>
    %97 = tpu.matmul %96, %81, %cst_34 {dimension_numbers = #tpu.dot_dimension_numbers<[1], [0], [0], [1], [0, 0, 1, 1], [], []>} : vector<8x8xf32>, vector<8x8xf32>, vector<8x8xf32> -> vector<8x8xf32>
    %98 = vector.extract_strided_slice %37 {offsets = [0, 24], sizes = [8, 8], strides = [1, 1]} : vector<16x32xf32> to vector<8x8xf32>
    %99 = vector.extract_strided_slice %38 {offsets = [0, 24], sizes = [8, 8], strides = [1, 1]} : vector<16x32xf32> to vector<8x8xf32>
    %100 = vector.extract_strided_slice %39 {offsets = [0, 24], sizes = [8, 8], strides = [1, 1]} : vector<16x32xf32> to vector<8x8xf32>
    %cst_35 = arith.constant dense<0.000000e+00> : vector<8x8xf32>
    %101 = tpu.matmul %98, %99, %cst_35 {dimension_numbers = #tpu.dot_dimension_numbers<[1], [1], [0], [0], [0, 0, 1, 0], [], []>} : vector<8x8xf32>, vector<8x8xf32>, vector<8x8xf32> -> vector<8x8xf32>
    %cst_36 = arith.constant 0.353553385 : f32
    %102 = vector.broadcast %cst_36 : f32 to vector<8x8xf32>
    %103 = arith.mulf %101, %102 : vector<8x8xf32>
    %104 = vector.broadcast %40 : vector<1x8xf32> to vector<8x8xf32>
    %105 = arith.addf %103, %104 : vector<8x8xf32>
    %cst_37 = arith.constant dense<0xFF800000> : vector<8xf32>
    %106 = vector.multi_reduction <maximumf>, %105, %cst_37 [1] : vector<8x8xf32> to vector<8xf32>
    %107 = vector.shape_cast %106 : vector<8xf32> to vector<8x1xf32>
    %108 = vector.broadcast %107 : vector<8x1xf32> to vector<8x8xf32>
    %109 = arith.subf %105, %108 : vector<8x8xf32>
    %110 = math.exp %109 : vector<8x8xf32>
    %cst_38 = arith.constant dense<0.000000e+00> : vector<8xf32>
    %111 = vector.multi_reduction <add>, %110, %cst_38 [1] : vector<8x8xf32> to vector<8xf32>
    %112 = vector.shape_cast %111 : vector<8xf32> to vector<8x1xf32>
    %113 = tpu.reciprocal %112 {approx = true} : vector<8x1xf32> -> vector<8x1xf32>
    %114 = vector.broadcast %113 : vector<8x1xf32> to vector<8x8xf32>
    %115 = arith.mulf %110, %114 : vector<8x8xf32>
    %cst_39 = arith.constant dense<0.000000e+00> : vector<8x8xf32>
    %116 = tpu.matmul %115, %100, %cst_39 {dimension_numbers = #tpu.dot_dimension_numbers<[1], [0], [0], [1], [0, 0, 1, 1], [], []>} : vector<8x8xf32>, vector<8x8xf32>, vector<8x8xf32> -> vector<8x8xf32>
    %117 = tpu.concatenate %59, %78, %97, %116 in 1 : vector<8x8xf32>, vector<8x8xf32>, vector<8x8xf32>, vector<8x8xf32> -> vector<8x32xf32>
    %118 = vector.extract_strided_slice %29 {offsets = [1, 0], sizes = [1, 8], strides = [1, 1]} : vector<2x8xf32> to vector<1x8xf32>
    %119 = vector.extract_strided_slice %37 {offsets = [8, 0], sizes = [8, 8], strides = [1, 1]} : vector<16x32xf32> to vector<8x8xf32>
    %120 = vector.extract_strided_slice %38 {offsets = [8, 0], sizes = [8, 8], strides = [1, 1]} : vector<16x32xf32> to vector<8x8xf32>
    %121 = vector.extract_strided_slice %39 {offsets = [8, 0], sizes = [8, 8], strides = [1, 1]} : vector<16x32xf32> to vector<8x8xf32>
    %cst_40 = arith.constant dense<0.000000e+00> : vector<8x8xf32>
    %122 = tpu.matmul %119, %120, %cst_40 {dimension_numbers = #tpu.dot_dimension_numbers<[1], [1], [0], [0], [0, 0, 1, 0], [], []>} : vector<8x8xf32>, vector<8x8xf32>, vector<8x8xf32> -> vector<8x8xf32>
    %cst_41 = arith.constant 0.353553385 : f32
    %123 = vector.broadcast %cst_41 : f32 to vector<8x8xf32>
    %124 = arith.mulf %122, %123 : vector<8x8xf32>
    %125 = vector.broadcast %118 : vector<1x8xf32> to vector<8x8xf32>
    %126 = arith.addf %124, %125 : vector<8x8xf32>
    %cst_42 = arith.constant dense<0xFF800000> : vector<8xf32>
    %127 = vector.multi_reduction <maximumf>, %126, %cst_42 [1] : vector<8x8xf32> to vector<8xf32>
    %128 = vector.shape_cast %127 : vector<8xf32> to vector<8x1xf32>
    %129 = vector.broadcast %128 : vector<8x1xf32> to vector<8x8xf32>
    %130 = arith.subf %126, %129 : vector<8x8xf32>
    %131 = math.exp %130 : vector<8x8xf32>
    %cst_43 = arith.constant dense<0.000000e+00> : vector<8xf32>
    %132 = vector.multi_reduction <add>, %131, %cst_43 [1] : vector<8x8xf32> to vector<8xf32>
    %133 = vector.shape_cast %132 : vector<8xf32> to vector<8x1xf32>
    %134 = tpu.reciprocal %133 {approx = true} : vector<8x1xf32> -> vector<8x1xf32>
    %135 = vector.broadcast %134 : vector<8x1xf32> to vector<8x8xf32>
    %136 = arith.mulf %131, %135 : vector<8x8xf32>
    %cst_44 = arith.constant dense<0.000000e+00> : vector<8x8xf32>
    %137 = tpu.matmul %136, %121, %cst_44 {dimension_numbers = #tpu.dot_dimension_numbers<[1], [0], [0], [1], [0, 0, 1, 1], [], []>} : vector<8x8xf32>, vector<8x8xf32>, vector<8x8xf32> -> vector<8x8xf32>
    %138 = vector.extract_strided_slice %37 {offsets = [8, 8], sizes = [8, 8], strides = [1, 1]} : vector<16x32xf32> to vector<8x8xf32>
    %139 = vector.extract_strided_slice %38 {offsets = [8, 8], sizes = [8, 8], strides = [1, 1]} : vector<16x32xf32> to vector<8x8xf32>
    %140 = vector.extract_strided_slice %39 {offsets = [8, 8], sizes = [8, 8], strides = [1, 1]} : vector<16x32xf32> to vector<8x8xf32>
    %cst_45 = arith.constant dense<0.000000e+00> : vector<8x8xf32>
    %141 = tpu.matmul %138, %139, %cst_45 {dimension_numbers = #tpu.dot_dimension_numbers<[1], [1], [0], [0], [0, 0, 1, 0], [], []>} : vector<8x8xf32>, vector<8x8xf32>, vector<8x8xf32> -> vector<8x8xf32>
    %cst_46 = arith.constant 0.353553385 : f32
    %142 = vector.broadcast %cst_46 : f32 to vector<8x8xf32>
    %143 = arith.mulf %141, %142 : vector<8x8xf32>
    %144 = vector.broadcast %118 : vector<1x8xf32> to vector<8x8xf32>
    %145 = arith.addf %143, %144 : vector<8x8xf32>
    %cst_47 = arith.constant dense<0xFF800000> : vector<8xf32>
    %146 = vector.multi_reduction <maximumf>, %145, %cst_47 [1] : vector<8x8xf32> to vector<8xf32>
    %147 = vector.shape_cast %146 : vector<8xf32> to vector<8x1xf32>
    %148 = vector.broadcast %147 : vector<8x1xf32> to vector<8x8xf32>
    %149 = arith.subf %145, %148 : vector<8x8xf32>
    %150 = math.exp %149 : vector<8x8xf32>
    %cst_48 = arith.constant dense<0.000000e+00> : vector<8xf32>
    %151 = vector.multi_reduction <add>, %150, %cst_48 [1] : vector<8x8xf32> to vector<8xf32>
    %152 = vector.shape_cast %151 : vector<8xf32> to vector<8x1xf32>
    %153 = tpu.reciprocal %152 {approx = true} : vector<8x1xf32> -> vector<8x1xf32>
    %154 = vector.broadcast %153 : vector<8x1xf32> to vector<8x8xf32>
    %155 = arith.mulf %150, %154 : vector<8x8xf32>
    %cst_49 = arith.constant dense<0.000000e+00> : vector<8x8xf32>
    %156 = tpu.matmul %155, %140, %cst_49 {dimension_numbers = #tpu.dot_dimension_numbers<[1], [0], [0], [1], [0, 0, 1, 1], [], []>} : vector<8x8xf32>, vector<8x8xf32>, vector<8x8xf32> -> vector<8x8xf32>
    %157 = vector.extract_strided_slice %37 {offsets = [8, 16], sizes = [8, 8], strides = [1, 1]} : vector<16x32xf32> to vector<8x8xf32>
    %158 = vector.extract_strided_slice %38 {offsets = [8, 16], sizes = [8, 8], strides = [1, 1]} : vector<16x32xf32> to vector<8x8xf32>
    %159 = vector.extract_strided_slice %39 {offsets = [8, 16], sizes = [8, 8], strides = [1, 1]} : vector<16x32xf32> to vector<8x8xf32>
    %cst_50 = arith.constant dense<0.000000e+00> : vector<8x8xf32>
    %160 = tpu.matmul %157, %158, %cst_50 {dimension_numbers = #tpu.dot_dimension_numbers<[1], [1], [0], [0], [0, 0, 1, 0], [], []>} : vector<8x8xf32>, vector<8x8xf32>, vector<8x8xf32> -> vector<8x8xf32>
    %cst_51 = arith.constant 0.353553385 : f32
    %161 = vector.broadcast %cst_51 : f32 to vector<8x8xf32>
    %162 = arith.mulf %160, %161 : vector<8x8xf32>
    %163 = vector.broadcast %118 : vector<1x8xf32> to vector<8x8xf32>
    %164 = arith.addf %162, %163 : vector<8x8xf32>
    %cst_52 = arith.constant dense<0xFF800000> : vector<8xf32>
    %165 = vector.multi_reduction <maximumf>, %164, %cst_52 [1] : vector<8x8xf32> to vector<8xf32>
    %166 = vector.shape_cast %165 : vector<8xf32> to vector<8x1xf32>
    %167 = vector.broadcast %166 : vector<8x1xf32> to vector<8x8xf32>
    %168 = arith.subf %164, %167 : vector<8x8xf32>
    %169 = math.exp %168 : vector<8x8xf32>
    %cst_53 = arith.constant dense<0.000000e+00> : vector<8xf32>
    %170 = vector.multi_reduction <add>, %169, %cst_53 [1] : vector<8x8xf32> to vector<8xf32>
    %171 = vector.shape_cast %170 : vector<8xf32> to vector<8x1xf32>
    %172 = tpu.reciprocal %171 {approx = true} : vector<8x1xf32> -> vector<8x1xf32>
    %173 = vector.broadcast %172 : vector<8x1xf32> to vector<8x8xf32>
    %174 = arith.mulf %169, %173 : vector<8x8xf32>
    %cst_54 = arith.constant dense<0.000000e+00> : vector<8x8xf32>
    %175 = tpu.matmul %174, %159, %cst_54 {dimension_numbers = #tpu.dot_dimension_numbers<[1], [0], [0], [1], [0, 0, 1, 1], [], []>} : vector<8x8xf32>, vector<8x8xf32>, vector<8x8xf32> -> vector<8x8xf32>
    %176 = vector.extract_strided_slice %37 {offsets = [8, 24], sizes = [8, 8], strides = [1, 1]} : vector<16x32xf32> to vector<8x8xf32>
    %177 = vector.extract_strided_slice %38 {offsets = [8, 24], sizes = [8, 8], strides = [1, 1]} : vector<16x32xf32> to vector<8x8xf32>
    %178 = vector.extract_strided_slice %39 {offsets = [8, 24], sizes = [8, 8], strides = [1, 1]} : vector<16x32xf32> to vector<8x8xf32>
    %cst_55 = arith.constant dense<0.000000e+00> : vector<8x8xf32>
    %179 = tpu.matmul %176, %177, %cst_55 {dimension_numbers = #tpu.dot_dimension_numbers<[1], [1], [0], [0], [0, 0, 1, 0], [], []>} : vector<8x8xf32>, vector<8x8xf32>, vector<8x8xf32> -> vector<8x8xf32>
    %cst_56 = arith.constant 0.353553385 : f32
    %180 = vector.broadcast %cst_56 : f32 to vector<8x8xf32>
    %181 = arith.mulf %179, %180 : vector<8x8xf32>
    %182 = vector.broadcast %118 : vector<1x8xf32> to vector<8x8xf32>
    %183 = arith.addf %181, %182 : vector<8x8xf32>
    %cst_57 = arith.constant dense<0xFF800000> : vector<8xf32>
    %184 = vector.multi_reduction <maximumf>, %183, %cst_57 [1] : vector<8x8xf32> to vector<8xf32>
    %185 = vector.shape_cast %184 : vector<8xf32> to vector<8x1xf32>
    %186 = vector.broadcast %185 : vector<8x1xf32> to vector<8x8xf32>
    %187 = arith.subf %183, %186 : vector<8x8xf32>
    %188 = math.exp %187 : vector<8x8xf32>
    %cst_58 = arith.constant dense<0.000000e+00> : vector<8xf32>
    %189 = vector.multi_reduction <add>, %188, %cst_58 [1] : vector<8x8xf32> to vector<8xf32>
    %190 = vector.shape_cast %189 : vector<8xf32> to vector<8x1xf32>
    %191 = tpu.reciprocal %190 {approx = true} : vector<8x1xf32> -> vector<8x1xf32>
    %192 = vector.broadcast %191 : vector<8x1xf32> to vector<8x8xf32>
    %193 = arith.mulf %188, %192 : vector<8x8xf32>
    %cst_59 = arith.constant dense<0.000000e+00> : vector<8x8xf32>
    %194 = tpu.matmul %193, %178, %cst_59 {dimension_numbers = #tpu.dot_dimension_numbers<[1], [0], [0], [1], [0, 0, 1, 1], [], []>} : vector<8x8xf32>, vector<8x8xf32>, vector<8x8xf32> -> vector<8x8xf32>
    %195 = tpu.concatenate %137, %156, %175, %194 in 1 : vector<8x8xf32>, vector<8x8xf32>, vector<8x8xf32>, vector<8x8xf32> -> vector<8x32xf32>
    %196 = tpu.concatenate %117, %195 in 0 : vector<8x32xf32>, vector<8x32xf32> -> vector<16x32xf32>
    %c0_60 = arith.constant 0 : index
    %c0_61 = arith.constant 0 : index
    %c0_62 = arith.constant 0 : index
    %197 = vector.load %arg6[%c0_60, %c0_61, %c0_62] : memref<2x32x32xf32, #tpu.memory_space<vmem>>, vector<1x32x32xf32>
    %198 = vector.shape_cast %197 : vector<1x32x32xf32> to vector<32x32xf32>
    %cst_63 = arith.constant dense<0.000000e+00> : vector<16x32xf32>
    %199 = tpu.matmul %196, %198, %cst_63 {dimension_numbers = #tpu.dot_dimension_numbers<[1], [0], [0], [1], [0, 0, 1, 1], [], []>} : vector<16x32xf32>, vector<32x32xf32>, vector<16x32xf32> -> vector<16x32xf32>
    %c0_64 = arith.constant 0 : index
    %c0_65 = arith.constant 0 : index
    %c0_66 = arith.constant 0 : index
    %200 = vector.load %arg7[%c0_64, %c0_65, %c0_66] : memref<2x1x32xf32, #tpu.memory_space<vmem>>, vector<1x1x32xf32>
    %201 = vector.shape_cast %200 : vector<1x1x32xf32> to vector<1x32xf32>
    %202 = vector.broadcast %201 : vector<1x32xf32> to vector<16x32xf32>
    %203 = arith.addf %199, %202 : vector<16x32xf32>
    %204 = arith.addf %24, %203 : vector<16x32xf32>
    %c0_67 = arith.constant 0 : index
    %c0_68 = arith.constant 0 : index
    %c0_69 = arith.constant 0 : index
    %205 = vector.load %arg8[%c0_67, %c0_68, %c0_69] : memref<2x1x32xf32, #tpu.memory_space<vmem>>, vector<1x1x32xf32>
    %206 = vector.shape_cast %205 : vector<1x1x32xf32> to vector<1x32xf32>
    %c0_70 = arith.constant 0 : index
    %c0_71 = arith.constant 0 : index
    %c0_72 = arith.constant 0 : index
    %207 = vector.load %arg9[%c0_70, %c0_71, %c0_72] : memref<2x1x32xf32, #tpu.memory_space<vmem>>, vector<1x1x32xf32>
    %208 = vector.shape_cast %207 : vector<1x1x32xf32> to vector<1x32xf32>
    %cst_73 = arith.constant dense<0.000000e+00> : vector<16xf32>
    %209 = vector.multi_reduction <add>, %204, %cst_73 [1] : vector<16x32xf32> to vector<16xf32>
    %210 = vector.shape_cast %209 : vector<16xf32> to vector<16x1xf32>
    %cst_74 = arith.constant 3.200000e+01 : f32
    %211 = vector.broadcast %cst_74 : f32 to vector<16x1xf32>
    %212 = arith.divf %210, %211 : vector<16x1xf32>
    %213 = vector.broadcast %212 : vector<16x1xf32> to vector<16x32xf32>
    %214 = arith.subf %204, %213 : vector<16x32xf32>
    %215 = arith.mulf %214, %214 : vector<16x32xf32>
    %cst_75 = arith.constant dense<0.000000e+00> : vector<16xf32>
    %216 = vector.multi_reduction <add>, %215, %cst_75 [1] : vector<16x32xf32> to vector<16xf32>
    %217 = vector.shape_cast %216 : vector<16xf32> to vector<16x1xf32>
    %cst_76 = arith.constant 3.200000e+01 : f32
    %218 = vector.broadcast %cst_76 : f32 to vector<16x1xf32>
    %219 = arith.divf %217, %218 : vector<16x1xf32>
    %220 = vector.broadcast %212 : vector<16x1xf32> to vector<16x32xf32>
    %221 = arith.subf %204, %220 : vector<16x32xf32>
    %cst_77 = arith.constant 9.99999996E-13 : f32
    %222 = vector.broadcast %cst_77 : f32 to vector<16x1xf32>
    %223 = arith.addf %219, %222 : vector<16x1xf32>
    %224 = math.rsqrt %223 : vector<16x1xf32>
    %225 = vector.broadcast %224 : vector<16x1xf32> to vector<16x32xf32>
    %226 = arith.mulf %221, %225 : vector<16x32xf32>
    %227 = vector.broadcast %206 : vector<1x32xf32> to vector<16x32xf32>
    %228 = arith.mulf %226, %227 : vector<16x32xf32>
    %229 = vector.broadcast %208 : vector<1x32xf32> to vector<16x32xf32>
    %230 = arith.addf %228, %229 : vector<16x32xf32>
    %c0_78 = arith.constant 0 : index
    %c0_79 = arith.constant 0 : index
    %c0_80 = arith.constant 0 : index
    %231 = vector.load %arg10[%c0_78, %c0_79, %c0_80] : memref<2x32x64xf32, #tpu.memory_space<vmem>>, vector<1x32x64xf32>
    %232 = vector.shape_cast %231 : vector<1x32x64xf32> to vector<32x64xf32>
    %cst_81 = arith.constant dense<0.000000e+00> : vector<16x64xf32>
    %233 = tpu.matmul %230, %232, %cst_81 {dimension_numbers = #tpu.dot_dimension_numbers<[1], [0], [0], [1], [0, 0, 1, 1], [], []>} : vector<16x32xf32>, vector<32x64xf32>, vector<16x64xf32> -> vector<16x64xf32>
    %c0_82 = arith.constant 0 : index
    %c0_83 = arith.constant 0 : index
    %c0_84 = arith.constant 0 : index
    %234 = vector.load %arg11[%c0_82, %c0_83, %c0_84] : memref<2x1x64xf32, #tpu.memory_space<vmem>>, vector<1x1x64xf32>
    %235 = vector.shape_cast %234 : vector<1x1x64xf32> to vector<1x64xf32>
    %236 = vector.broadcast %235 : vector<1x64xf32> to vector<16x64xf32>
    %237 = arith.addf %233, %236 : vector<16x64xf32>
    %cst_85 = arith.constant 5.000000e-01 : f32
    %238 = vector.broadcast %cst_85 : f32 to vector<16x64xf32>
    %239 = arith.mulf %238, %237 : vector<16x64xf32>
    %cst_86 = arith.constant 4.471500e-02 : f32
    %240 = vector.broadcast %cst_86 : f32 to vector<16x64xf32>
    %241 = arith.mulf %240, %237 : vector<16x64xf32>
    %242 = arith.mulf %241, %237 : vector<16x64xf32>
    %243 = arith.mulf %242, %237 : vector<16x64xf32>
    %244 = arith.addf %237, %243 : vector<16x64xf32>
    %cst_87 = arith.constant 0.797884583 : f32
    %245 = vector.broadcast %cst_87 : f32 to vector<16x64xf32>
    %246 = arith.mulf %245, %244 : vector<16x64xf32>
    %247 = math.tanh %246 : vector<16x64xf32>
    %cst_88 = arith.constant 1.000000e+00 : f32
    %248 = vector.broadcast %cst_88 : f32 to vector<16x64xf32>
    %249 = arith.addf %248, %247 : vector<16x64xf32>
    %250 = arith.mulf %239, %249 : vector<16x64xf32>
    %c0_89 = arith.constant 0 : index
    %c0_90 = arith.constant 0 : index
    %c0_91 = arith.constant 0 : index
    %251 = vector.load %arg12[%c0_89, %c0_90, %c0_91] : memref<2x64x32xf32, #tpu.memory_space<vmem>>, vector<1x64x32xf32>
    %252 = vector.shape_cast %251 : vector<1x64x32xf32> to vector<64x32xf32>
    %cst_92 = arith.constant dense<0.000000e+00> : vector<16x32xf32>
    %253 = tpu.matmul %250, %252, %cst_92 {dimension_numbers = #tpu.dot_dimension_numbers<[1], [0], [0], [1], [0, 0, 1, 1], [], []>} : vector<16x64xf32>, vector<64x32xf32>, vector<16x32xf32> -> vector<16x32xf32>
    %c0_93 = arith.constant 0 : index
    %c0_94 = arith.constant 0 : index
    %c0_95 = arith.constant 0 : index
    %254 = vector.load %arg13[%c0_93, %c0_94, %c0_95] : memref<2x1x32xf32, #tpu.memory_space<vmem>>, vector<1x1x32xf32>
    %255 = vector.shape_cast %254 : vector<1x1x32xf32> to vector<1x32xf32>
    %256 = vector.broadcast %255 : vector<1x32xf32> to vector<16x32xf32>
    %257 = arith.addf %253, %256 : vector<16x32xf32>
    %258 = arith.addf %230, %257 : vector<16x32xf32>
    %c0_96 = arith.constant 0 : index
    %c0_97 = arith.constant 0 : index
    %c0_98 = arith.constant 0 : index
    %259 = vector.load %arg14[%c0_96, %c0_97, %c0_98] : memref<2x1x32xf32, #tpu.memory_space<vmem>>, vector<1x1x32xf32>
    %260 = vector.shape_cast %259 : vector<1x1x32xf32> to vector<1x32xf32>
    %c0_99 = arith.constant 0 : index
    %c0_100 = arith.constant 0 : index
    %c0_101 = arith.constant 0 : index
    %261 = vector.load %arg15[%c0_99, %c0_100, %c0_101] : memref<2x1x32xf32, #tpu.memory_space<vmem>>, vector<1x1x32xf32>
    %262 = vector.shape_cast %261 : vector<1x1x32xf32> to vector<1x32xf32>
    %cst_102 = arith.constant dense<0.000000e+00> : vector<16xf32>
    %263 = vector.multi_reduction <add>, %258, %cst_102 [1] : vector<16x32xf32> to vector<16xf32>
    %264 = vector.shape_cast %263 : vector<16xf32> to vector<16x1xf32>
    %cst_103 = arith.constant 3.200000e+01 : f32
    %265 = vector.broadcast %cst_103 : f32 to vector<16x1xf32>
    %266 = arith.divf %264, %265 : vector<16x1xf32>
    %267 = vector.broadcast %266 : vector<16x1xf32> to vector<16x32xf32>
    %268 = arith.subf %258, %267 : vector<16x32xf32>
    %269 = arith.mulf %268, %268 : vector<16x32xf32>
    %cst_104 = arith.constant dense<0.000000e+00> : vector<16xf32>
    %270 = vector.multi_reduction <add>, %269, %cst_104 [1] : vector<16x32xf32> to vector<16xf32>
    %271 = vector.shape_cast %270 : vector<16xf32> to vector<16x1xf32>
    %cst_105 = arith.constant 3.200000e+01 : f32
    %272 = vector.broadcast %cst_105 : f32 to vector<16x1xf32>
    %273 = arith.divf %271, %272 : vector<16x1xf32>
    %274 = vector.broadcast %266 : vector<16x1xf32> to vector<16x32xf32>
    %275 = arith.subf %258, %274 : vector<16x32xf32>
    %cst_106 = arith.constant 9.99999996E-13 : f32
    %276 = vector.broadcast %cst_106 : f32 to vector<16x1xf32>
    %277 = arith.addf %273, %276 : vector<16x1xf32>
    %278 = math.rsqrt %277 : vector<16x1xf32>
    %279 = vector.broadcast %278 : vector<16x1xf32> to vector<16x32xf32>
    %280 = arith.mulf %275, %279 : vector<16x32xf32>
    %281 = vector.broadcast %260 : vector<1x32xf32> to vector<16x32xf32>
    %282 = arith.mulf %280, %281 : vector<16x32xf32>
    %283 = vector.broadcast %262 : vector<1x32xf32> to vector<16x32xf32>
    %284 = arith.addf %282, %283 : vector<16x32xf32>
    %c1 = arith.constant 1 : index
    %c0_107 = arith.constant 0 : index
    %c0_108 = arith.constant 0 : index
    %285 = vector.load %arg4[%c1, %c0_107, %c0_108] : memref<2x32x96xf32, #tpu.memory_space<vmem>>, vector<1x32x96xf32>
    %286 = vector.shape_cast %285 : vector<1x32x96xf32> to vector<32x96xf32>
    %cst_109 = arith.constant dense<0.000000e+00> : vector<16x96xf32>
    %287 = tpu.matmul %284, %286, %cst_109 {dimension_numbers = #tpu.dot_dimension_numbers<[1], [0], [0], [1], [0, 0, 1, 1], [], []>} : vector<16x32xf32>, vector<32x96xf32>, vector<16x96xf32> -> vector<16x96xf32>
    %c1_110 = arith.constant 1 : index
    %c0_111 = arith.constant 0 : index
    %c0_112 = arith.constant 0 : index
    %288 = vector.load %arg5[%c1_110, %c0_111, %c0_112] : memref<2x1x96xf32, #tpu.memory_space<vmem>>, vector<1x1x96xf32>
    %289 = vector.shape_cast %288 : vector<1x1x96xf32> to vector<1x96xf32>
    %290 = vector.broadcast %289 : vector<1x96xf32> to vector<16x96xf32>
    %291 = arith.addf %287, %290 : vector<16x96xf32>
    %292 = vector.extract_strided_slice %291 {offsets = [0, 0], sizes = [16, 32], strides = [1, 1]} : vector<16x96xf32> to vector<16x32xf32>
    %293 = vector.extract_strided_slice %291 {offsets = [0, 32], sizes = [16, 32], strides = [1, 1]} : vector<16x96xf32> to vector<16x32xf32>
    %294 = vector.extract_strided_slice %291 {offsets = [0, 64], sizes = [16, 32], strides = [1, 1]} : vector<16x96xf32> to vector<16x32xf32>
    %295 = vector.extract_strided_slice %29 {offsets = [0, 0], sizes = [1, 8], strides = [1, 1]} : vector<2x8xf32> to vector<1x8xf32>
    %296 = vector.extract_strided_slice %292 {offsets = [0, 0], sizes = [8, 8], strides = [1, 1]} : vector<16x32xf32> to vector<8x8xf32>
    %297 = vector.extract_strided_slice %293 {offsets = [0, 0], sizes = [8, 8], strides = [1, 1]} : vector<16x32xf32> to vector<8x8xf32>
    %298 = vector.extract_strided_slice %294 {offsets = [0, 0], sizes = [8, 8], strides = [1, 1]} : vector<16x32xf32> to vector<8x8xf32>
    %cst_113 = arith.constant dense<0.000000e+00> : vector<8x8xf32>
    %299 = tpu.matmul %296, %297, %cst_113 {dimension_numbers = #tpu.dot_dimension_numbers<[1], [1], [0], [0], [0, 0, 1, 0], [], []>} : vector<8x8xf32>, vector<8x8xf32>, vector<8x8xf32> -> vector<8x8xf32>
    %cst_114 = arith.constant 0.353553385 : f32
    %300 = vector.broadcast %cst_114 : f32 to vector<8x8xf32>
    %301 = arith.mulf %299, %300 : vector<8x8xf32>
    %302 = vector.broadcast %295 : vector<1x8xf32> to vector<8x8xf32>
    %303 = arith.addf %301, %302 : vector<8x8xf32>
    %cst_115 = arith.constant dense<0xFF800000> : vector<8xf32>
    %304 = vector.multi_reduction <maximumf>, %303, %cst_115 [1] : vector<8x8xf32> to vector<8xf32>
    %305 = vector.shape_cast %304 : vector<8xf32> to vector<8x1xf32>
    %306 = vector.broadcast %305 : vector<8x1xf32> to vector<8x8xf32>
    %307 = arith.subf %303, %306 : vector<8x8xf32>
    %308 = math.exp %307 : vector<8x8xf32>
    %cst_116 = arith.constant dense<0.000000e+00> : vector<8xf32>
    %309 = vector.multi_reduction <add>, %308, %cst_116 [1] : vector<8x8xf32> to vector<8xf32>
    %310 = vector.shape_cast %309 : vector<8xf32> to vector<8x1xf32>
    %311 = tpu.reciprocal %310 {approx = true} : vector<8x1xf32> -> vector<8x1xf32>
    %312 = vector.broadcast %311 : vector<8x1xf32> to vector<8x8xf32>
    %313 = arith.mulf %308, %312 : vector<8x8xf32>
    %cst_117 = arith.constant dense<0.000000e+00> : vector<8x8xf32>
    %314 = tpu.matmul %313, %298, %cst_117 {dimension_numbers = #tpu.dot_dimension_numbers<[1], [0], [0], [1], [0, 0, 1, 1], [], []>} : vector<8x8xf32>, vector<8x8xf32>, vector<8x8xf32> -> vector<8x8xf32>
    %315 = vector.extract_strided_slice %292 {offsets = [0, 8], sizes = [8, 8], strides = [1, 1]} : vector<16x32xf32> to vector<8x8xf32>
    %316 = vector.extract_strided_slice %293 {offsets = [0, 8], sizes = [8, 8], strides = [1, 1]} : vector<16x32xf32> to vector<8x8xf32>
    %317 = vector.extract_strided_slice %294 {offsets = [0, 8], sizes = [8, 8], strides = [1, 1]} : vector<16x32xf32> to vector<8x8xf32>
    %cst_118 = arith.constant dense<0.000000e+00> : vector<8x8xf32>
    %318 = tpu.matmul %315, %316, %cst_118 {dimension_numbers = #tpu.dot_dimension_numbers<[1], [1], [0], [0], [0, 0, 1, 0], [], []>} : vector<8x8xf32>, vector<8x8xf32>, vector<8x8xf32> -> vector<8x8xf32>
    %cst_119 = arith.constant 0.353553385 : f32
    %319 = vector.broadcast %cst_119 : f32 to vector<8x8xf32>
    %320 = arith.mulf %318, %319 : vector<8x8xf32>
    %321 = vector.broadcast %295 : vector<1x8xf32> to vector<8x8xf32>
    %322 = arith.addf %320, %321 : vector<8x8xf32>
    %cst_120 = arith.constant dense<0xFF800000> : vector<8xf32>
    %323 = vector.multi_reduction <maximumf>, %322, %cst_120 [1] : vector<8x8xf32> to vector<8xf32>
    %324 = vector.shape_cast %323 : vector<8xf32> to vector<8x1xf32>
    %325 = vector.broadcast %324 : vector<8x1xf32> to vector<8x8xf32>
    %326 = arith.subf %322, %325 : vector<8x8xf32>
    %327 = math.exp %326 : vector<8x8xf32>
    %cst_121 = arith.constant dense<0.000000e+00> : vector<8xf32>
    %328 = vector.multi_reduction <add>, %327, %cst_121 [1] : vector<8x8xf32> to vector<8xf32>
    %329 = vector.shape_cast %328 : vector<8xf32> to vector<8x1xf32>
    %330 = tpu.reciprocal %329 {approx = true} : vector<8x1xf32> -> vector<8x1xf32>
    %331 = vector.broadcast %330 : vector<8x1xf32> to vector<8x8xf32>
    %332 = arith.mulf %327, %331 : vector<8x8xf32>
    %cst_122 = arith.constant dense<0.000000e+00> : vector<8x8xf32>
    %333 = tpu.matmul %332, %317, %cst_122 {dimension_numbers = #tpu.dot_dimension_numbers<[1], [0], [0], [1], [0, 0, 1, 1], [], []>} : vector<8x8xf32>, vector<8x8xf32>, vector<8x8xf32> -> vector<8x8xf32>
    %334 = vector.extract_strided_slice %292 {offsets = [0, 16], sizes = [8, 8], strides = [1, 1]} : vector<16x32xf32> to vector<8x8xf32>
    %335 = vector.extract_strided_slice %293 {offsets = [0, 16], sizes = [8, 8], strides = [1, 1]} : vector<16x32xf32> to vector<8x8xf32>
    %336 = vector.extract_strided_slice %294 {offsets = [0, 16], sizes = [8, 8], strides = [1, 1]} : vector<16x32xf32> to vector<8x8xf32>
    %cst_123 = arith.constant dense<0.000000e+00> : vector<8x8xf32>
    %337 = tpu.matmul %334, %335, %cst_123 {dimension_numbers = #tpu.dot_dimension_numbers<[1], [1], [0], [0], [0, 0, 1, 0], [], []>} : vector<8x8xf32>, vector<8x8xf32>, vector<8x8xf32> -> vector<8x8xf32>
    %cst_124 = arith.constant 0.353553385 : f32
    %338 = vector.broadcast %cst_124 : f32 to vector<8x8xf32>
    %339 = arith.mulf %337, %338 : vector<8x8xf32>
    %340 = vector.broadcast %295 : vector<1x8xf32> to vector<8x8xf32>
    %341 = arith.addf %339, %340 : vector<8x8xf32>
    %cst_125 = arith.constant dense<0xFF800000> : vector<8xf32>
    %342 = vector.multi_reduction <maximumf>, %341, %cst_125 [1] : vector<8x8xf32> to vector<8xf32>
    %343 = vector.shape_cast %342 : vector<8xf32> to vector<8x1xf32>
    %344 = vector.broadcast %343 : vector<8x1xf32> to vector<8x8xf32>
    %345 = arith.subf %341, %344 : vector<8x8xf32>
    %346 = math.exp %345 : vector<8x8xf32>
    %cst_126 = arith.constant dense<0.000000e+00> : vector<8xf32>
    %347 = vector.multi_reduction <add>, %346, %cst_126 [1] : vector<8x8xf32> to vector<8xf32>
    %348 = vector.shape_cast %347 : vector<8xf32> to vector<8x1xf32>
    %349 = tpu.reciprocal %348 {approx = true} : vector<8x1xf32> -> vector<8x1xf32>
    %350 = vector.broadcast %349 : vector<8x1xf32> to vector<8x8xf32>
    %351 = arith.mulf %346, %350 : vector<8x8xf32>
    %cst_127 = arith.constant dense<0.000000e+00> : vector<8x8xf32>
    %352 = tpu.matmul %351, %336, %cst_127 {dimension_numbers = #tpu.dot_dimension_numbers<[1], [0], [0], [1], [0, 0, 1, 1], [], []>} : vector<8x8xf32>, vector<8x8xf32>, vector<8x8xf32> -> vector<8x8xf32>
    %353 = vector.extract_strided_slice %292 {offsets = [0, 24], sizes = [8, 8], strides = [1, 1]} : vector<16x32xf32> to vector<8x8xf32>
    %354 = vector.extract_strided_slice %293 {offsets = [0, 24], sizes = [8, 8], strides = [1, 1]} : vector<16x32xf32> to vector<8x8xf32>
    %355 = vector.extract_strided_slice %294 {offsets = [0, 24], sizes = [8, 8], strides = [1, 1]} : vector<16x32xf32> to vector<8x8xf32>
    %cst_128 = arith.constant dense<0.000000e+00> : vector<8x8xf32>
    %356 = tpu.matmul %353, %354, %cst_128 {dimension_numbers = #tpu.dot_dimension_numbers<[1], [1], [0], [0], [0, 0, 1, 0], [], []>} : vector<8x8xf32>, vector<8x8xf32>, vector<8x8xf32> -> vector<8x8xf32>
    %cst_129 = arith.constant 0.353553385 : f32
    %357 = vector.broadcast %cst_129 : f32 to vector<8x8xf32>
    %358 = arith.mulf %356, %357 : vector<8x8xf32>
    %359 = vector.broadcast %295 : vector<1x8xf32> to vector<8x8xf32>
    %360 = arith.addf %358, %359 : vector<8x8xf32>
    %cst_130 = arith.constant dense<0xFF800000> : vector<8xf32>
    %361 = vector.multi_reduction <maximumf>, %360, %cst_130 [1] : vector<8x8xf32> to vector<8xf32>
    %362 = vector.shape_cast %361 : vector<8xf32> to vector<8x1xf32>
    %363 = vector.broadcast %362 : vector<8x1xf32> to vector<8x8xf32>
    %364 = arith.subf %360, %363 : vector<8x8xf32>
    %365 = math.exp %364 : vector<8x8xf32>
    %cst_131 = arith.constant dense<0.000000e+00> : vector<8xf32>
    %366 = vector.multi_reduction <add>, %365, %cst_131 [1] : vector<8x8xf32> to vector<8xf32>
    %367 = vector.shape_cast %366 : vector<8xf32> to vector<8x1xf32>
    %368 = tpu.reciprocal %367 {approx = true} : vector<8x1xf32> -> vector<8x1xf32>
    %369 = vector.broadcast %368 : vector<8x1xf32> to vector<8x8xf32>
    %370 = arith.mulf %365, %369 : vector<8x8xf32>
    %cst_132 = arith.constant dense<0.000000e+00> : vector<8x8xf32>
    %371 = tpu.matmul %370, %355, %cst_132 {dimension_numbers = #tpu.dot_dimension_numbers<[1], [0], [0], [1], [0, 0, 1, 1], [], []>} : vector<8x8xf32>, vector<8x8xf32>, vector<8x8xf32> -> vector<8x8xf32>
    %372 = tpu.concatenate %314, %333, %352, %371 in 1 : vector<8x8xf32>, vector<8x8xf32>, vector<8x8xf32>, vector<8x8xf32> -> vector<8x32xf32>
    %373 = vector.extract_strided_slice %29 {offsets = [1, 0], sizes = [1, 8], strides = [1, 1]} : vector<2x8xf32> to vector<1x8xf32>
    %374 = vector.extract_strided_slice %292 {offsets = [8, 0], sizes = [8, 8], strides = [1, 1]} : vector<16x32xf32> to vector<8x8xf32>
    %375 = vector.extract_strided_slice %293 {offsets = [8, 0], sizes = [8, 8], strides = [1, 1]} : vector<16x32xf32> to vector<8x8xf32>
    %376 = vector.extract_strided_slice %294 {offsets = [8, 0], sizes = [8, 8], strides = [1, 1]} : vector<16x32xf32> to vector<8x8xf32>
    %cst_133 = arith.constant dense<0.000000e+00> : vector<8x8xf32>
    %377 = tpu.matmul %374, %375, %cst_133 {dimension_numbers = #tpu.dot_dimension_numbers<[1], [1], [0], [0], [0, 0, 1, 0], [], []>} : vector<8x8xf32>, vector<8x8xf32>, vector<8x8xf32> -> vector<8x8xf32>
    %cst_134 = arith.constant 0.353553385 : f32
    %378 = vector.broadcast %cst_134 : f32 to vector<8x8xf32>
    %379 = arith.mulf %377, %378 : vector<8x8xf32>
    %380 = vector.broadcast %373 : vector<1x8xf32> to vector<8x8xf32>
    %381 = arith.addf %379, %380 : vector<8x8xf32>
    %cst_135 = arith.constant dense<0xFF800000> : vector<8xf32>
    %382 = vector.multi_reduction <maximumf>, %381, %cst_135 [1] : vector<8x8xf32> to vector<8xf32>
    %383 = vector.shape_cast %382 : vector<8xf32> to vector<8x1xf32>
    %384 = vector.broadcast %383 : vector<8x1xf32> to vector<8x8xf32>
    %385 = arith.subf %381, %384 : vector<8x8xf32>
    %386 = math.exp %385 : vector<8x8xf32>
    %cst_136 = arith.constant dense<0.000000e+00> : vector<8xf32>
    %387 = vector.multi_reduction <add>, %386, %cst_136 [1] : vector<8x8xf32> to vector<8xf32>
    %388 = vector.shape_cast %387 : vector<8xf32> to vector<8x1xf32>
    %389 = tpu.reciprocal %388 {approx = true} : vector<8x1xf32> -> vector<8x1xf32>
    %390 = vector.broadcast %389 : vector<8x1xf32> to vector<8x8xf32>
    %391 = arith.mulf %386, %390 : vector<8x8xf32>
    %cst_137 = arith.constant dense<0.000000e+00> : vector<8x8xf32>
    %392 = tpu.matmul %391, %376, %cst_137 {dimension_numbers = #tpu.dot_dimension_numbers<[1], [0], [0], [1], [0, 0, 1, 1], [], []>} : vector<8x8xf32>, vector<8x8xf32>, vector<8x8xf32> -> vector<8x8xf32>
    %393 = vector.extract_strided_slice %292 {offsets = [8, 8], sizes = [8, 8], strides = [1, 1]} : vector<16x32xf32> to vector<8x8xf32>
    %394 = vector.extract_strided_slice %293 {offsets = [8, 8], sizes = [8, 8], strides = [1, 1]} : vector<16x32xf32> to vector<8x8xf32>
    %395 = vector.extract_strided_slice %294 {offsets = [8, 8], sizes = [8, 8], strides = [1, 1]} : vector<16x32xf32> to vector<8x8xf32>
    %cst_138 = arith.constant dense<0.000000e+00> : vector<8x8xf32>
    %396 = tpu.matmul %393, %394, %cst_138 {dimension_numbers = #tpu.dot_dimension_numbers<[1], [1], [0], [0], [0, 0, 1, 0], [], []>} : vector<8x8xf32>, vector<8x8xf32>, vector<8x8xf32> -> vector<8x8xf32>
    %cst_139 = arith.constant 0.353553385 : f32
    %397 = vector.broadcast %cst_139 : f32 to vector<8x8xf32>
    %398 = arith.mulf %396, %397 : vector<8x8xf32>
    %399 = vector.broadcast %373 : vector<1x8xf32> to vector<8x8xf32>
    %400 = arith.addf %398, %399 : vector<8x8xf32>
    %cst_140 = arith.constant dense<0xFF800000> : vector<8xf32>
    %401 = vector.multi_reduction <maximumf>, %400, %cst_140 [1] : vector<8x8xf32> to vector<8xf32>
    %402 = vector.shape_cast %401 : vector<8xf32> to vector<8x1xf32>
    %403 = vector.broadcast %402 : vector<8x1xf32> to vector<8x8xf32>
    %404 = arith.subf %400, %403 : vector<8x8xf32>
    %405 = math.exp %404 : vector<8x8xf32>
    %cst_141 = arith.constant dense<0.000000e+00> : vector<8xf32>
    %406 = vector.multi_reduction <add>, %405, %cst_141 [1] : vector<8x8xf32> to vector<8xf32>
    %407 = vector.shape_cast %406 : vector<8xf32> to vector<8x1xf32>
    %408 = tpu.reciprocal %407 {approx = true} : vector<8x1xf32> -> vector<8x1xf32>
    %409 = vector.broadcast %408 : vector<8x1xf32> to vector<8x8xf32>
    %410 = arith.mulf %405, %409 : vector<8x8xf32>
    %cst_142 = arith.constant dense<0.000000e+00> : vector<8x8xf32>
    %411 = tpu.matmul %410, %395, %cst_142 {dimension_numbers = #tpu.dot_dimension_numbers<[1], [0], [0], [1], [0, 0, 1, 1], [], []>} : vector<8x8xf32>, vector<8x8xf32>, vector<8x8xf32> -> vector<8x8xf32>
    %412 = vector.extract_strided_slice %292 {offsets = [8, 16], sizes = [8, 8], strides = [1, 1]} : vector<16x32xf32> to vector<8x8xf32>
    %413 = vector.extract_strided_slice %293 {offsets = [8, 16], sizes = [8, 8], strides = [1, 1]} : vector<16x32xf32> to vector<8x8xf32>
    %414 = vector.extract_strided_slice %294 {offsets = [8, 16], sizes = [8, 8], strides = [1, 1]} : vector<16x32xf32> to vector<8x8xf32>
    %cst_143 = arith.constant dense<0.000000e+00> : vector<8x8xf32>
    %415 = tpu.matmul %412, %413, %cst_143 {dimension_numbers = #tpu.dot_dimension_numbers<[1], [1], [0], [0], [0, 0, 1, 0], [], []>} : vector<8x8xf32>, vector<8x8xf32>, vector<8x8xf32> -> vector<8x8xf32>
    %cst_144 = arith.constant 0.353553385 : f32
    %416 = vector.broadcast %cst_144 : f32 to vector<8x8xf32>
    %417 = arith.mulf %415, %416 : vector<8x8xf32>
    %418 = vector.broadcast %373 : vector<1x8xf32> to vector<8x8xf32>
    %419 = arith.addf %417, %418 : vector<8x8xf32>
    %cst_145 = arith.constant dense<0xFF800000> : vector<8xf32>
    %420 = vector.multi_reduction <maximumf>, %419, %cst_145 [1] : vector<8x8xf32> to vector<8xf32>
    %421 = vector.shape_cast %420 : vector<8xf32> to vector<8x1xf32>
    %422 = vector.broadcast %421 : vector<8x1xf32> to vector<8x8xf32>
    %423 = arith.subf %419, %422 : vector<8x8xf32>
    %424 = math.exp %423 : vector<8x8xf32>
    %cst_146 = arith.constant dense<0.000000e+00> : vector<8xf32>
    %425 = vector.multi_reduction <add>, %424, %cst_146 [1] : vector<8x8xf32> to vector<8xf32>
    %426 = vector.shape_cast %425 : vector<8xf32> to vector<8x1xf32>
    %427 = tpu.reciprocal %426 {approx = true} : vector<8x1xf32> -> vector<8x1xf32>
    %428 = vector.broadcast %427 : vector<8x1xf32> to vector<8x8xf32>
    %429 = arith.mulf %424, %428 : vector<8x8xf32>
    %cst_147 = arith.constant dense<0.000000e+00> : vector<8x8xf32>
    %430 = tpu.matmul %429, %414, %cst_147 {dimension_numbers = #tpu.dot_dimension_numbers<[1], [0], [0], [1], [0, 0, 1, 1], [], []>} : vector<8x8xf32>, vector<8x8xf32>, vector<8x8xf32> -> vector<8x8xf32>
    %431 = vector.extract_strided_slice %292 {offsets = [8, 24], sizes = [8, 8], strides = [1, 1]} : vector<16x32xf32> to vector<8x8xf32>
    %432 = vector.extract_strided_slice %293 {offsets = [8, 24], sizes = [8, 8], strides = [1, 1]} : vector<16x32xf32> to vector<8x8xf32>
    %433 = vector.extract_strided_slice %294 {offsets = [8, 24], sizes = [8, 8], strides = [1, 1]} : vector<16x32xf32> to vector<8x8xf32>
    %cst_148 = arith.constant dense<0.000000e+00> : vector<8x8xf32>
    %434 = tpu.matmul %431, %432, %cst_148 {dimension_numbers = #tpu.dot_dimension_numbers<[1], [1], [0], [0], [0, 0, 1, 0], [], []>} : vector<8x8xf32>, vector<8x8xf32>, vector<8x8xf32> -> vector<8x8xf32>
    %cst_149 = arith.constant 0.353553385 : f32
    %435 = vector.broadcast %cst_149 : f32 to vector<8x8xf32>
    %436 = arith.mulf %434, %435 : vector<8x8xf32>
    %437 = vector.broadcast %373 : vector<1x8xf32> to vector<8x8xf32>
    %438 = arith.addf %436, %437 : vector<8x8xf32>
    %cst_150 = arith.constant dense<0xFF800000> : vector<8xf32>
    %439 = vector.multi_reduction <maximumf>, %438, %cst_150 [1] : vector<8x8xf32> to vector<8xf32>
    %440 = vector.shape_cast %439 : vector<8xf32> to vector<8x1xf32>
    %441 = vector.broadcast %440 : vector<8x1xf32> to vector<8x8xf32>
    %442 = arith.subf %438, %441 : vector<8x8xf32>
    %443 = math.exp %442 : vector<8x8xf32>
    %cst_151 = arith.constant dense<0.000000e+00> : vector<8xf32>
    %444 = vector.multi_reduction <add>, %443, %cst_151 [1] : vector<8x8xf32> to vector<8xf32>
    %445 = vector.shape_cast %444 : vector<8xf32> to vector<8x1xf32>
    %446 = tpu.reciprocal %445 {approx = true} : vector<8x1xf32> -> vector<8x1xf32>
    %447 = vector.broadcast %446 : vector<8x1xf32> to vector<8x8xf32>
    %448 = arith.mulf %443, %447 : vector<8x8xf32>
    %cst_152 = arith.constant dense<0.000000e+00> : vector<8x8xf32>
    %449 = tpu.matmul %448, %433, %cst_152 {dimension_numbers = #tpu.dot_dimension_numbers<[1], [0], [0], [1], [0, 0, 1, 1], [], []>} : vector<8x8xf32>, vector<8x8xf32>, vector<8x8xf32> -> vector<8x8xf32>
    %450 = tpu.concatenate %392, %411, %430, %449 in 1 : vector<8x8xf32>, vector<8x8xf32>, vector<8x8xf32>, vector<8x8xf32> -> vector<8x32xf32>
    %451 = tpu.concatenate %372, %450 in 0 : vector<8x32xf32>, vector<8x32xf32> -> vector<16x32xf32>
    %c1_153 = arith.constant 1 : index
    %c0_154 = arith.constant 0 : index
    %c0_155 = arith.constant 0 : index
    %452 = vector.load %arg6[%c1_153, %c0_154, %c0_155] : memref<2x32x32xf32, #tpu.memory_space<vmem>>, vector<1x32x32xf32>
    %453 = vector.shape_cast %452 : vector<1x32x32xf32> to vector<32x32xf32>
    %cst_156 = arith.constant dense<0.000000e+00> : vector<16x32xf32>
    %454 = tpu.matmul %451, %453, %cst_156 {dimension_numbers = #tpu.dot_dimension_numbers<[1], [0], [0], [1], [0, 0, 1, 1], [], []>} : vector<16x32xf32>, vector<32x32xf32>, vector<16x32xf32> -> vector<16x32xf32>
    %c1_157 = arith.constant 1 : index
    %c0_158 = arith.constant 0 : index
    %c0_159 = arith.constant 0 : index
    %455 = vector.load %arg7[%c1_157, %c0_158, %c0_159] : memref<2x1x32xf32, #tpu.memory_space<vmem>>, vector<1x1x32xf32>
    %456 = vector.shape_cast %455 : vector<1x1x32xf32> to vector<1x32xf32>
    %457 = vector.broadcast %456 : vector<1x32xf32> to vector<16x32xf32>
    %458 = arith.addf %454, %457 : vector<16x32xf32>
    %459 = arith.addf %284, %458 : vector<16x32xf32>
    %c1_160 = arith.constant 1 : index
    %c0_161 = arith.constant 0 : index
    %c0_162 = arith.constant 0 : index
    %460 = vector.load %arg8[%c1_160, %c0_161, %c0_162] : memref<2x1x32xf32, #tpu.memory_space<vmem>>, vector<1x1x32xf32>
    %461 = vector.shape_cast %460 : vector<1x1x32xf32> to vector<1x32xf32>
    %c1_163 = arith.constant 1 : index
    %c0_164 = arith.constant 0 : index
    %c0_165 = arith.constant 0 : index
    %462 = vector.load %arg9[%c1_163, %c0_164, %c0_165] : memref<2x1x32xf32, #tpu.memory_space<vmem>>, vector<1x1x32xf32>
    %463 = vector.shape_cast %462 : vector<1x1x32xf32> to vector<1x32xf32>
    %cst_166 = arith.constant dense<0.000000e+00> : vector<16xf32>
    %464 = vector.multi_reduction <add>, %459, %cst_166 [1] : vector<16x32xf32> to vector<16xf32>
    %465 = vector.shape_cast %464 : vector<16xf32> to vector<16x1xf32>
    %cst_167 = arith.constant 3.200000e+01 : f32
    %466 = vector.broadcast %cst_167 : f32 to vector<16x1xf32>
    %467 = arith.divf %465, %466 : vector<16x1xf32>
    %468 = vector.broadcast %467 : vector<16x1xf32> to vector<16x32xf32>
    %469 = arith.subf %459, %468 : vector<16x32xf32>
    %470 = arith.mulf %469, %469 : vector<16x32xf32>
    %cst_168 = arith.constant dense<0.000000e+00> : vector<16xf32>
    %471 = vector.multi_reduction <add>, %470, %cst_168 [1] : vector<16x32xf32> to vector<16xf32>
    %472 = vector.shape_cast %471 : vector<16xf32> to vector<16x1xf32>
    %cst_169 = arith.constant 3.200000e+01 : f32
    %473 = vector.broadcast %cst_169 : f32 to vector<16x1xf32>
    %474 = arith.divf %472, %473 : vector<16x1xf32>
    %475 = vector.broadcast %467 : vector<16x1xf32> to vector<16x32xf32>
    %476 = arith.subf %459, %475 : vector<16x32xf32>
    %cst_170 = arith.constant 9.99999996E-13 : f32
    %477 = vector.broadcast %cst_170 : f32 to vector<16x1xf32>
    %478 = arith.addf %474, %477 : vector<16x1xf32>
    %479 = math.rsqrt %478 : vector<16x1xf32>
    %480 = vector.broadcast %479 : vector<16x1xf32> to vector<16x32xf32>
    %481 = arith.mulf %476, %480 : vector<16x32xf32>
    %482 = vector.broadcast %461 : vector<1x32xf32> to vector<16x32xf32>
    %483 = arith.mulf %481, %482 : vector<16x32xf32>
    %484 = vector.broadcast %463 : vector<1x32xf32> to vector<16x32xf32>
    %485 = arith.addf %483, %484 : vector<16x32xf32>
    %c1_171 = arith.constant 1 : index
    %c0_172 = arith.constant 0 : index
    %c0_173 = arith.constant 0 : index
    %486 = vector.load %arg10[%c1_171, %c0_172, %c0_173] : memref<2x32x64xf32, #tpu.memory_space<vmem>>, vector<1x32x64xf32>
    %487 = vector.shape_cast %486 : vector<1x32x64xf32> to vector<32x64xf32>
    %cst_174 = arith.constant dense<0.000000e+00> : vector<16x64xf32>
    %488 = tpu.matmul %485, %487, %cst_174 {dimension_numbers = #tpu.dot_dimension_numbers<[1], [0], [0], [1], [0, 0, 1, 1], [], []>} : vector<16x32xf32>, vector<32x64xf32>, vector<16x64xf32> -> vector<16x64xf32>
    %c1_175 = arith.constant 1 : index
    %c0_176 = arith.constant 0 : index
    %c0_177 = arith.constant 0 : index
    %489 = vector.load %arg11[%c1_175, %c0_176, %c0_177] : memref<2x1x64xf32, #tpu.memory_space<vmem>>, vector<1x1x64xf32>
    %490 = vector.shape_cast %489 : vector<1x1x64xf32> to vector<1x64xf32>
    %491 = vector.broadcast %490 : vector<1x64xf32> to vector<16x64xf32>
    %492 = arith.addf %488, %491 : vector<16x64xf32>
    %cst_178 = arith.constant 5.000000e-01 : f32
    %493 = vector.broadcast %cst_178 : f32 to vector<16x64xf32>
    %494 = arith.mulf %493, %492 : vector<16x64xf32>
    %cst_179 = arith.constant 4.471500e-02 : f32
    %495 = vector.broadcast %cst_179 : f32 to vector<16x64xf32>
    %496 = arith.mulf %495, %492 : vector<16x64xf32>
    %497 = arith.mulf %496, %492 : vector<16x64xf32>
    %498 = arith.mulf %497, %492 : vector<16x64xf32>
    %499 = arith.addf %492, %498 : vector<16x64xf32>
    %cst_180 = arith.constant 0.797884583 : f32
    %500 = vector.broadcast %cst_180 : f32 to vector<16x64xf32>
    %501 = arith.mulf %500, %499 : vector<16x64xf32>
    %502 = math.tanh %501 : vector<16x64xf32>
    %cst_181 = arith.constant 1.000000e+00 : f32
    %503 = vector.broadcast %cst_181 : f32 to vector<16x64xf32>
    %504 = arith.addf %503, %502 : vector<16x64xf32>
    %505 = arith.mulf %494, %504 : vector<16x64xf32>
    %c1_182 = arith.constant 1 : index
    %c0_183 = arith.constant 0 : index
    %c0_184 = arith.constant 0 : index
    %506 = vector.load %arg12[%c1_182, %c0_183, %c0_184] : memref<2x64x32xf32, #tpu.memory_space<vmem>>, vector<1x64x32xf32>
    %507 = vector.shape_cast %506 : vector<1x64x32xf32> to vector<64x32xf32>
    %cst_185 = arith.constant dense<0.000000e+00> : vector<16x32xf32>
    %508 = tpu.matmul %505, %507, %cst_185 {dimension_numbers = #tpu.dot_dimension_numbers<[1], [0], [0], [1], [0, 0, 1, 1], [], []>} : vector<16x64xf32>, vector<64x32xf32>, vector<16x32xf32> -> vector<16x32xf32>
    %c1_186 = arith.constant 1 : index
    %c0_187 = arith.constant 0 : index
    %c0_188 = arith.constant 0 : index
    %509 = vector.load %arg13[%c1_186, %c0_187, %c0_188] : memref<2x1x32xf32, #tpu.memory_space<vmem>>, vector<1x1x32xf32>
    %510 = vector.shape_cast %509 : vector<1x1x32xf32> to vector<1x32xf32>
    %511 = vector.broadcast %510 : vector<1x32xf32> to vector<16x32xf32>
    %512 = arith.addf %508, %511 : vector<16x32xf32>
    %513 = arith.addf %485, %512 : vector<16x32xf32>
    %c1_189 = arith.constant 1 : index
    %c0_190 = arith.constant 0 : index
    %c0_191 = arith.constant 0 : index
    %514 = vector.load %arg14[%c1_189, %c0_190, %c0_191] : memref<2x1x32xf32, #tpu.memory_space<vmem>>, vector<1x1x32xf32>
    %515 = vector.shape_cast %514 : vector<1x1x32xf32> to vector<1x32xf32>
    %c1_192 = arith.constant 1 : index
    %c0_193 = arith.constant 0 : index
    %c0_194 = arith.constant 0 : index
    %516 = vector.load %arg15[%c1_192, %c0_193, %c0_194] : memref<2x1x32xf32, #tpu.memory_space<vmem>>, vector<1x1x32xf32>
    %517 = vector.shape_cast %516 : vector<1x1x32xf32> to vector<1x32xf32>
    %cst_195 = arith.constant dense<0.000000e+00> : vector<16xf32>
    %518 = vector.multi_reduction <add>, %513, %cst_195 [1] : vector<16x32xf32> to vector<16xf32>
    %519 = vector.shape_cast %518 : vector<16xf32> to vector<16x1xf32>
    %cst_196 = arith.constant 3.200000e+01 : f32
    %520 = vector.broadcast %cst_196 : f32 to vector<16x1xf32>
    %521 = arith.divf %519, %520 : vector<16x1xf32>
    %522 = vector.broadcast %521 : vector<16x1xf32> to vector<16x32xf32>
    %523 = arith.subf %513, %522 : vector<16x32xf32>
    %524 = arith.mulf %523, %523 : vector<16x32xf32>
    %cst_197 = arith.constant dense<0.000000e+00> : vector<16xf32>
    %525 = vector.multi_reduction <add>, %524, %cst_197 [1] : vector<16x32xf32> to vector<16xf32>
    %526 = vector.shape_cast %525 : vector<16xf32> to vector<16x1xf32>
    %cst_198 = arith.constant 3.200000e+01 : f32
    %527 = vector.broadcast %cst_198 : f32 to vector<16x1xf32>
    %528 = arith.divf %526, %527 : vector<16x1xf32>
    %529 = vector.broadcast %521 : vector<16x1xf32> to vector<16x32xf32>
    %530 = arith.subf %513, %529 : vector<16x32xf32>
    %cst_199 = arith.constant 9.99999996E-13 : f32
    %531 = vector.broadcast %cst_199 : f32 to vector<16x1xf32>
    %532 = arith.addf %528, %531 : vector<16x1xf32>
    %533 = math.rsqrt %532 : vector<16x1xf32>
    %534 = vector.broadcast %533 : vector<16x1xf32> to vector<16x32xf32>
    %535 = arith.mulf %530, %534 : vector<16x32xf32>
    %536 = vector.broadcast %515 : vector<1x32xf32> to vector<16x32xf32>
    %537 = arith.mulf %535, %536 : vector<16x32xf32>
    %538 = vector.broadcast %517 : vector<1x32xf32> to vector<16x32xf32>
    %539 = arith.addf %537, %538 : vector<16x32xf32>
    %540 = vector.extract_strided_slice %539 {offsets = [0, 0], sizes = [1, 32], strides = [1, 1]} : vector<16x32xf32> to vector<1x32xf32>
    %541 = vector.extract_strided_slice %539 {offsets = [8, 0], sizes = [1, 32], strides = [1, 1]} : vector<16x32xf32> to vector<1x32xf32>
    %542 = tpu.concatenate %540, %541 in 0 : vector<1x32xf32>, vector<1x32xf32> -> vector<2x32xf32>
    %c0_200 = arith.constant 0 : index
    %c0_201 = arith.constant 0 : index
    %543 = vector.load %arg16[%c0_200, %c0_201] : memref<32x32xf32, #tpu.memory_space<vmem>>, vector<32x32xf32>
    %cst_202 = arith.constant dense<0.000000e+00> : vector<2x32xf32>
    %544 = tpu.matmul %542, %543, %cst_202 {dimension_numbers = #tpu.dot_dimension_numbers<[1], [0], [0], [1], [0, 0, 1, 1], [], []>} : vector<2x32xf32>, vector<32x32xf32>, vector<2x32xf32> -> vector<2x32xf32>
    %c0_203 = arith.constant 0 : index
    %c0_204 = arith.constant 0 : index
    %545 = vector.load %arg17[%c0_203, %c0_204] : memref<1x32xf32, #tpu.memory_space<vmem>>, vector<1x32xf32>
    %546 = vector.broadcast %545 : vector<1x32xf32> to vector<2x32xf32>
    %547 = arith.addf %544, %546 : vector<2x32xf32>
    %548 = math.tanh %547 : vector<2x32xf32>
    %c0_205 = arith.constant 0 : index
    %c0_206 = arith.constant 0 : index
    %549 = vector.load %arg18[%c0_205, %c0_206] : memref<32x2xf32, #tpu.memory_space<vmem>>, vector<32x2xf32>
    %cst_207 = arith.constant dense<0.000000e+00> : vector<2x2xf32>
    %550 = tpu.matmul %548, %549, %cst_207 {dimension_numbers = #tpu.dot_dimension_numbers<[1], [0], [0], [1], [0, 0, 1, 1], [], []>} : vector<2x32xf32>, vector<32x2xf32>, vector<2x2xf32> -> vector<2x2xf32>
    %c0_208 = arith.constant 0 : index
    %c0_209 = arith.constant 0 : index
    %551 = vector.load %arg19[%c0_208, %c0_209] : memref<1x2xf32, #tpu.memory_space<vmem>>, vector<1x2xf32>
    %552 = vector.broadcast %551 : vector<1x2xf32> to vector<2x2xf32>
    %553 = arith.addf %550, %552 : vector<2x2xf32>
    %c0_210 = arith.constant 0 : index
    %c0_211 = arith.constant 0 : index
    %554 = vector.load %arg20[%c0_210, %c0_211] : memref<2x2xf32, #tpu.memory_space<vmem>>, vector<2x2xf32>
    tpu.vector_store %arg20[%c0_210, %c0_211], %553 {strides = array<i32>} : memref<2x2xf32, #tpu.memory_space<vmem>>, vector<2x2xf32>,
    return
  }
}

</mosaic_0001>

<bundles_post_ra>
// kernel: bert_classifier.1
= control target key start
LH: loop header
LB: loop body
LE: loop exit
PB: predicated region body
PF: predicated region fallthrough
CT: control target
= control target key end

     0   :  { %s2874_s0 = inlined_call_operand.vmem [shape: f32[16,32], index: 0, kind: input, shape index: {}]   ;;  %s2875_s1 = inlined_call_operand.vmem [shape: f32[2,8], index: 1, kind: input, shape index: {}]   ;;  %s2876_s2 = inlined_call_operand.vmem [shape: f32[1,32], index: 2, kind: input, shape index: {}]   ;;  %s2877_s3 = inlined_call_operand.vmem [shape: f32[1,32], index: 3, kind: input, shape index: {}]   ;;  %s2878_s4 = inlined_call_operand.vmem [shape: f32[2,32,96], index: 4, kind: input, shape index: {}]   ;;  %s2879_s5 = inlined_call_operand.vmem [shape: f32[2,1,96], index: 5, kind: input, shape index: {}]   ;;  %s2880_s6 = inlined_call_operand.vmem [shape: f32[2,32,32], index: 6, kind: input, shape index: {}]   ;;  %s2881_s7 = inlined_call_operand.vmem [shape: f32[2,1,32], index: 7, kind: input, shape index: {}]   ;;  %s2882_s8 = inlined_call_operand.vmem [shape: f32[2,1,32], index: 8, kind: input, shape index: {}]   ;;  %s2883_s9 = inlined_call_operand.vmem [shape: f32[2,1,32], index: 9, kind: input, shape index: {}]   ;;  %s2884_s10 = inlined_call_operand.vmem [shape: f32[2,32,64], index: 10, kind: input, shape index: {}]   ;;  %s2885_s11 = inlined_call_operand.vmem [shape: f32[2,1,64], index: 11, kind: input, shape index: {}]   ;;  %s2886_s12 = inlined_call_operand.vmem [shape: f32[2,64,32], index: 12, kind: input, shape index: {}]   ;;  %s2887_s13 = inlined_call_operand.vmem [shape: f32[2,1,32], index: 13, kind: input, shape index: {}]   ;;  %s2888_s14 = inlined_call_operand.vmem [shape: f32[2,1,32], index: 14, kind: input, shape index: {}]   ;;  %s2889_s15 = inlined_call_operand.vmem [shape: f32[2,1,32], index: 15, kind: input, shape index: {}]   ;;  %s2890_s16 = inlined_call_operand.vmem [shape: f32[32,32], index: 16, kind: input, shape index: {}]   ;;  %s2891_s17 = inlined_call_operand.vmem [shape: f32[1,32], index: 17, kind: input, shape index: {}]   ;;  %s2892_s18 = inlined_call_operand.vmem [shape: f32[32,2], index: 18, kind: input, shape index: {}]   ;;  %s2893_s19 = inlined_call_operand.vmem [shape: f32[1,2], index: 19, kind: input, shape index: {}]   ;;  %s2894_s20 = inlined_call_operand.hbm [shape: f32[2,2], index: 20, kind: output, shape index: {}]  }
   0x1   :  { %2917 = sst [smem:[#allocation5_spill]] %s2874_s0 }
   0x2   :  { %2918 = sst [smem:[#allocation6_spill]] %s2875_s1 }
   0x3   :  { %2919 = sst [smem:[#allocation7_spill]] %s2876_s2 }
   0x4   :  { %2920 = sst [smem:[#allocation8_spill]] %s2877_s3 }
   0x5   :  { %2921 = sst [smem:[#allocation9_spill]] %s2878_s4 }
   0x6   :  { %s2922_s23 = sld [smem:[#allocation5_spill]]  ;;  %vm70_vm0 = vcmask 261120  }
   0xc   :  { %v66_v0 = vld [vmem:[%s2922_s23] sm:$0xff]  ;;  %v67_v1 = vld [vmem:[%s2922_s23 + $0x8] sm:$0xff] }
   0xd   :  { %v71_v2 = vsel %vm70_vm0, %v66_v0, 0.0  ;;  %v74_v3 = vsel %vm70_vm0, %v67_v1, 0.0 }
   0xe   :  { %72 = vadd.xlane.f32.xlu0 %v71_v2  ;;  %75 = vadd.xlane.f32.xlu1 %v74_v3 }
   0xf   :  { %25 = vsyncpa [#allocation3], 0  ;;  %v2191_v4 = vmov 32.0   ;;  %s2923_s26 = sld [smem:[#allocation9_spill]]  ;;  %v2357_v53 = vld [vmem:[%s2879_s5] ss:$0 sm:$0xff] }
  0x10   :  { %2069 = vrcp.f32 %v2191_v4  ;;  %s2924_s22 = sld [smem:[#allocation7_spill]]  ;;  %s2899_s27 = smov 120   ;;  %vm175_vm8 = vcmask 64512   ;;  %vm454_vm9 = vcmask 130048   ;;  %vm456_vm10 = vcmask 195584  }
  0x11   :  { %s2925_s2 = sld [smem:[#allocation8_spill]]  ;;  %s2193_s28 = smov 96   ;;  %vm903_vm14 = vcmask 523264  }
  0x12   :  { %s2194_s4 = smov 64   ;;  %s2907_s29 = smov 88  }
  0x13   :  { %s2905_s30 = smov 80   ;;  %s2903_s0 = smov 72  }
  0x14   :  { %s2897_s21 = smov 104   ;;  %s2926_s23 = sld [smem:[#allocation6_spill]] }
  0x15   :  { %v138_v21 = vld [vmem:[%s2923_s26 + $0x18] sm:$0xff]  ;;  %v137_v22 = vld [vmem:[%s2923_s26 + $0x10] sm:$0xff]  ;;  %v136_v23 = vld [vmem:[%s2923_s26 + $0x8] sm:$0xff]  ;;  %s2901_s24 = smov 112   ;;  %s2201_s25 = smov 40  }
  0x16   :  { %v2070_v5 = vpop.eup %2069  ;;  %161 = vmatpush.msra.mxu0 %v138_v21  ;;  %v135_v24 = vld [vmem:[%s2923_s26] sm:$0xff]  ;;  %s2911_s3 = smov 48   ;;  %s2909_s1 = smov 8  }
  0x17   :  { %v78_v6 = vmul.f32 32.0, %v2070_v5  ;;  %vm82_vm1 = vweird.f32 %v2070_v5  ;;  %v2049_v42 = vld [vmem:[%s2924_s22] ss:$0 sm:$0xff]  ;;  %s2913_s22 = smov 16  }
  0x18   :  { %162 = vmatpush.msra.mxu0 %v137_v22  ;;  %v2050_v46 = vld [vmem:[%s2925_s2] ss:$0 sm:$0xff]  ;;  %s2200_s2 = smov 56  }
  0x19   :  { %v79_v7 = vsub.f32 1.0, %v78_v6 }
  0x1a   :  { %163 = vmatpush.msra.mxu0 %v136_v23  ;;  %v132_v61 = vld [vmem:[%s2926_s23] sm:$0x3]  ;;  %s2915_s23 = smov 24  }
  0x1b   :  { %v80_v8 = vmul.f32 %v2070_v5, %v79_v7  ;;  %v133_v62 = vsub.f32 1.0, %v132_v61 }
  0x1c   :  { %164 = vmatpush.msra.mxu0 %v135_v24 }
  0x1d   :  { %v81_v9 = vadd.f32 %v2070_v5, %v80_v8 }
  0x1f   :  { %v2320_v10 = vsel %vm82_vm1, %v2070_v5, %v81_v9 }
  0x81   :  { %v73_v11 = vpop.xlane.xlu0 %72  ;;  %v76_v12 = vpop.xlane.xlu1 %75 }
  0x82   :  { %v84_v13 = vmul.f32 %v2320_v10, %v73_v11  ;;  %v85_v14 = vmul.f32 %v2320_v10, %v76_v12 }
  0x84   :  { %v86_v15 = vsub.f32 %v66_v0, %v84_v13  ;;  %v87_v16 = vsub.f32 %v67_v1, %v85_v14  ;;  %v2385_v0 = vmul.f32 -10000.0, %v133_v62 }
  0x86   :  { %v88_v17 = vmul.f32 %v86_v15, %v86_v15  ;;  %v89_v18 = vmul.f32 %v87_v16, %v87_v16  ;;  %v2388_v1 = vperm.slane %v2385_v0, 0 }
  0x88   :  { %v90_v19 = vsel %vm70_vm0, %v88_v17, 0.0  ;;  %v93_v20 = vsel %vm70_vm0, %v89_v18, 0.0 }
  0x89   :  { %91 = vadd.xlane.f32.xlu0 %v90_v19  ;;  %94 = vadd.xlane.f32.xlu1 %v93_v20 }
  0xfc   :  { %v92_v25 = vpop.xlane.xlu0 %91  ;;  %v95_v26 = vpop.xlane.xlu1 %94 }
  0xfd   :  { %v96_v27 = vmul.f32 %v92_v25, %v2320_v10  ;;  %v97_v28 = vmul.f32 %v95_v26, %v2320_v10 }
  0xff   :  { %v98_v29 = vadd.f32 1e-12, %v96_v27  ;;  %v99_v30 = vadd.f32 1e-12, %v97_v28 }
 0x101   :  { %2071 = vrsqrt.f32 %v98_v29  ;;  %vm116_vm2 = vweird.f32 %v99_v30  ;;  %vm106_vm5 = vweird.f32 %v98_v29 }
 0x102   :  { %2073 = vrsqrt.f32 %v99_v30 }
 0x107   :  { %v2072_v31 = vpop.eup %2071 }
 0x108   :  { %v2074_v32 = vpop.eup %2073  ;;  %v101_v33 = vmul.f32 %v2072_v31, %v98_v29  ;;  %vm107_vm4 = vweird.f32 %v2072_v31 }
 0x109   :  { %v111_v34 = vmul.f32 %v2074_v32, %v99_v30  ;;  %vm117_vm3 = vweird.f32 %v2074_v32  ;;  %vm108_vm7 = vmor %vm106_vm5, %vm107_vm4 }
 0x10a   :  { %v102_v35 = vmul.f32 %v2072_v31, %v101_v33  ;;  %vm118_vm6 = vmor %vm116_vm2, %vm117_vm3 }
 0x10b   :  { %v112_v36 = vmul.f32 %v2074_v32, %v111_v34 }
 0x10c   :  { %v103_v37 = vmul.f32 0.5, %v102_v35 }
 0x10d   :  { %v113_v38 = vmul.f32 0.5, %v112_v36 }
 0x10e   :  { %v104_v39 = vsub.f32 1.5, %v103_v37 }
 0x10f   :  { %v114_v40 = vsub.f32 1.5, %v113_v38 }
 0x110   :  { %v105_v41 = vmul.f32 %v2072_v31, %v104_v39 }
 0x111   :  { %v115_v43 = vmul.f32 %v2074_v32, %v114_v40 }
 0x112   :  { %v109_v44 = vsel %vm108_vm7, %v2072_v31, %v105_v41 }
 0x113   :  { %v120_v45 = vmul.f32 %v109_v44, %v86_v15  ;;  %v119_v47 = vsel %vm118_vm6, %v2074_v32, %v115_v43 }
 0x114   :  { %v121_v49 = vmul.f32 %v119_v47, %v87_v16 }
 0x115   :  { %v125_v48 = vmul.f32 %v2049_v42, %v120_v45 }
 0x116   :  { %v126_v51 = vmul.f32 %v2049_v42, %v121_v49 }
 0x117   :  { %v2346_v50 = vadd.f32 %v2050_v46, %v125_v48 }
 0x118   :  { %v2350_v52 = vadd.f32 %v2050_v46, %v126_v51 }
 0x119   :  { %1939 = vmatmul.msk.f32.vlgmr.msra.gmra.mxu0 %vm70_vm0, %v2346_v50 }
 0x121   :  { %1940 = vmatmul.msk.f32.gmra.mxu0 %vm70_vm0, %v2350_v52 }
 0x196   :  { %v166_v54 = vpop.f32.mrf.mxu0 }
 0x197   :  { %v2360_v55 = vadd.f32 %v2357_v53, %v166_v54 }
 0x199   :  { %240 = vrot.lane.b32.xlu0 %v2360_v55, %s2899_s27  ;;  %173 = vrot.lane.b32.xlu2 %v2360_v55, %s2193_s28 }
 0x19e   :  { %v169_v63 = vpop.f32.mrf.mxu0 }
 0x19f   :  { %v2410_v35 = vadd.f32 %v2357_v53, %v169_v63 }
 0x1a1   :  { %214 = vrot.lane.b32.xlu0 %v2360_v55, %s2194_s4  ;;  %242 = vrot.lane.b32.xlu2 %v2360_v55, %s2907_s29 }
 0x1a9   :  { %309 = vrot.lane.b32.xlu0 %v2360_v55, %s2905_s30 }
 0x1b1   :  { %376 = vrot.lane.b32.xlu0 %v2360_v55, %s2903_s0 }
 0x1b9   :  { %374 = vrot.lane.b32.xlu0 %v2360_v55, %s2897_s21 }
 0x1f3   :  { %v174_v56 = vpop.permute.xlu2 %173 }
 0x1f4   :  { %1941 = vmatpush.xpose.msk.msrb.mxu0 %vm175_vm8, %v174_v56 }
 0x1f7   :  { %1942 = vmatmul.msk.f32.vlgmr.msrb.gmra.mxu0 %vm175_vm8, %v2360_v55 }
 0x1fb   :  { %v243_v57 = vpop.permute.xlu2 %242 }
 0x1fc   :  { %1944 = vmatpush.xpose.msk.msra.mxu3 %vm175_vm8, %v243_v57 }
 0x20b   :  { %v241_v58 = vpop.permute.xlu0 %240 }
 0x20c   :  { %1945 = vmatmul.msk.f32.vlgmr.msra.gmra.mxu3 %vm175_vm8, %v241_v58 }
 0x213   :  { %v215_v59 = vpop.permute.xlu0 %214 }
 0x214   :  { %235 = vmatpush.msra.mxu2 %v215_v59 }
 0x21b   :  { %v310_v60 = vpop.permute.xlu0 %309 }
 0x21c   :  { %1947 = vmatpush.xpose.msk.msra.mxu1 %vm175_vm8, %v310_v60 }
 0x223   :  { %v377_v31 = vpop.permute.xlu0 %376 }
 0x22b   :  { %v375_v34 = vpop.permute.xlu0 %374 }
 0x274   :  { %v197_v2 = vpop.f32.mrf.mxu0 }
 0x275   :  { %v200_v3 = vmul.f32 0.35355338, %v197_v2 }
 0x277   :  { %v202_v4 = vadd.f32 %v2388_v1, %v200_v3 }
 0x279   :  { %v203_v5 = vsel %vm175_vm8, %v202_v4, -inf }
 0x27a   :  { %204 = vmax.xlane.f32.xlu1 %v203_v5 }
 0x28f   :  { %v265_v6 = vpop.f32.mrf.mxu3 }
 0x290   :  { %v268_v7 = vmul.f32 0.35355338, %v265_v6 }
 0x292   :  { %v269_v8 = vadd.f32 %v268_v7, %v2388_v1 }
 0x294   :  { %v270_v9 = vsel %vm175_vm8, %v269_v8, -inf }
 0x295   :  { %271 = vmax.xlane.f32.xlu2 %v270_v9 }
 0x2ad   :  { %307 = vrot.lane.b32.xlu2 %v2360_v55, %s2901_s24 }
 0x2ed   :  { %v205_v11 = vpop.xlane.xlu1 %204 }
 0x2ee   :  { %v206_v12 = vsub.f32 %v202_v4, %v205_v11 }
 0x2f0   :  { %v207_v13 = vmul.f32 1.442695, %v206_v12 }
 0x2f2   :  { %2075 = vpow2.f32 %v207_v13 }
 0x2f8   :  { %v2076_v14 = vpop.eup %2075 }
 0x2f9   :  { %v209_v15 = vsel %vm175_vm8, %v2076_v14, 0.0 }
 0x2fa   :  { %210 = vadd.xlane.f32.xlu1 %v209_v15 }
 0x308   :  { %v272_v16 = vpop.xlane.xlu2 %271 }
 0x309   :  { %v273_v17 = vsub.f32 %v269_v8, %v272_v16  ;;  %v2448_v8 = vperm.slane %v2385_v0, 1 }
 0x30b   :  { %v274_v18 = vmul.f32 1.442695, %v273_v17 }
 0x30d   :  { %2077 = vpow2.f32 %v274_v18 }
 0x310   :  { %v308_v19 = vpop.permute.xlu2 %307 }
 0x311   :  { %1948 = vmatmul.msk.f32.vlgmr.msra.gmra.mxu1 %vm175_vm8, %v308_v19 }
 0x313   :  { %v2078_v20 = vpop.eup %2077 }
 0x314   :  { %v276_v21 = vsel %vm175_vm8, %v2078_v20, 0.0 }
 0x315   :  { %277 = vadd.xlane.f32.xlu1 %v276_v21 }
 0x32e   :  { %281 = vrot.lane.b32.xlu1 %v2360_v55, %s2200_s2 }
 0x36d   :  { %v211_v22 = vpop.xlane.xlu1 %210 }
 0x36e   :  { %2079 = vrcp.f32 %v211_v22 }
 0x374   :  { %v2080_v23 = vpop.eup %2079 }
 0x375   :  { %v213_v24 = vmul.f32 %v2080_v23, %v2076_v14 }
 0x377   :  { %1943 = vmatmul.msk.f32.vlgmr.msra.gmra.mxu2 %vm175_vm8, %v213_v24 }
 0x388   :  { %v278_v29 = vpop.xlane.xlu1 %277 }
 0x389   :  { %2081 = vrcp.f32 %v278_v29  ;;  %v742_v29 = vld [vmem:[%s2880_s6 + $0x8] sm:$0xff] }
 0x38e   :  { %v332_v25 = vpop.f32.mrf.mxu1 }
 0x38f   :  { %v335_v26 = vmul.f32 0.35355338, %v332_v25  ;;  %v2082_v30 = vpop.eup %2081 }
 0x390   :  { %v280_v33 = vmul.f32 %v2082_v30, %v2078_v20 }
 0x391   :  { %v336_v27 = vadd.f32 %v335_v26, %v2388_v1  ;;  %v744_v26 = vld [vmem:[%s2880_s6 + $0x18] sm:$0xff] }
 0x393   :  { %v337_v28 = vsel %vm175_vm8, %v336_v27, -inf }
 0x394   :  { %338 = vmax.xlane.f32.xlu1 %v337_v28 }
 0x3a0   :  { %v282_v32 = vpop.permute.xlu1 %281 }
 0x3a1   :  { %302 = vmatpush.msrb.mxu2 %v282_v32 }
 0x3a2   :  { %1946 = vmatmul.msk.f32.vlgmr.msrb.gmra.mxu2 %vm175_vm8, %v280_v33 }
 0x3a3   :  { %1950 = vmatpush.xpose.msk.msra.mxu2 %vm175_vm8, %v377_v31 }
 0x3aa   :  { %1951 = vmatmul.msk.f32.vlgmr.msra.gmra.mxu2 %vm175_vm8, %v375_v34 }
 0x3ad   :  { %415 = vrot.lane.b32.xlu1 %v2360_v55, %s2201_s25 }
 0x3b5   :  { %594 = vrot.lane.b32.xlu1 %v2410_v35, %s2905_s30 }
 0x3fa   :  { %v2415_v41 = vpop.f32.mrf.mxu2 }
 0x407   :  { %v339_v36 = vpop.xlane.xlu1 %338 }
 0x408   :  { %v340_v37 = vsub.f32 %v336_v27, %v339_v36  ;;  %v743_v27 = vld [vmem:[%s2880_s6 + $0x10] sm:$0xff] }
 0x40a   :  { %v341_v38 = vmul.f32 1.442695, %v340_v37 }
 0x40c   :  { %2083 = vpow2.f32 %v341_v38 }
 0x412   :  { %v2084_v39 = vpop.eup %2083 }
 0x413   :  { %v343_v40 = vsel %vm175_vm8, %v2084_v39, 0.0 }
 0x414   :  { %344 = vadd.xlane.f32.xlu2 %v343_v40 }
 0x41f   :  { %v416_v42 = vpop.permute.xlu1 %415 }
 0x420   :  { %436 = vmatpush.msrb.mxu1 %v416_v42 }
 0x425   :  { %v304_v43 = vpop.f32.mrf.mxu2 }
 0x427   :  { %v595_v60 = vpop.permute.xlu1 %594 }
 0x42c   :  { %459 = vrot.lane.b32.xlu2 %v2410_v35, %s2193_s28 }
 0x42d   :  { %v399_v44 = vpop.f32.mrf.mxu2 }
 0x42e   :  { %v402_v45 = vmul.f32 0.35355338, %v399_v44 }
 0x430   :  { %v403_v46 = vadd.f32 %v402_v45, %v2388_v1 }
 0x432   :  { %v404_v47 = vsel %vm175_vm8, %v403_v46, -inf }
 0x433   :  { %405 = vmax.xlane.f32.xlu0 %v404_v47 }
 0x434   :  { %592 = vrot.lane.b32.xlu2 %v2410_v35, %s2901_s24  ;;  %s2929_s24 = smov 72  }
 0x447   :  { %348 = vrot.lane.b32.xlu0 %v2360_v55, %s2911_s3 }
 0x44f   :  { %527 = vrot.lane.b32.xlu0 %v2410_v35, %s2907_s29 }
 0x457   :  { %525 = vrot.lane.b32.xlu0 %v2410_v35, %s2899_s27 }
 0x45f   :  { %661 = vrot.lane.b32.xlu0 %v2410_v35, %s2903_s0  ;;  %s2927_s0 = smov 88  }
 0x467   :  { %442 = vrot.lane.b32.xlu0 %v304_v43, %s2909_s1  ;;  %v741_v43 = vld [vmem:[%s2880_s6] sm:$0xff] }
 0x487   :  { %v345_v53 = vpop.xlane.xlu2 %344 }
 0x48f   :  { %v460_v59 = vpop.permute.xlu2 %459 }
 0x497   :  { %v593_v63 = vpop.permute.xlu2 %592 }
 0x4a6   :  { %v406_v48 = vpop.xlane.xlu0 %405 }
 0x4a7   :  { %v407_v49 = vsub.f32 %v403_v46, %v406_v48 }
 0x4a9   :  { %v408_v51 = vmul.f32 1.442695, %v407_v49 }
 0x4ab   :  { %2085 = vpow2.f32 %v408_v51 }
 0x4ac   :  { %2087 = vrcp.f32 %v345_v53 }
 0x4b1   :  { %v2086_v54 = vpop.eup %2085 }
 0x4b2   :  { %v410_v55 = vsel %vm175_vm8, %v2086_v54, 0.0  ;;  %v2088_v56 = vpop.eup %2087 }
 0x4b3   :  { %411 = vadd.xlane.f32.xlu1 %v410_v55  ;;  %v347_v58 = vmul.f32 %v2088_v56, %v2084_v39 }
 0x4b9   :  { %v349_v57 = vpop.permute.xlu0 %348 }
 0x4ba   :  { %369 = vmatpush.msrb.mxu3 %v349_v57 }
 0x4bb   :  { %1949 = vmatmul.msk.f32.vlgmr.msrb.gmra.mxu3 %vm175_vm8, %v347_v58 }
 0x4bc   :  { %1953 = vmatpush.xpose.msk.msra.mxu3 %vm175_vm8, %v460_v59 }
 0x4c0   :  { %1959 = vmatpush.xpose.msk.msrb.mxu3 %vm175_vm8, %v595_v60 }
 0x4c1   :  { %v528_v61 = vpop.permute.xlu0 %527 }
 0x4c2   :  { %1956 = vmatpush.xpose.msk.msrb.mxu2 %vm175_vm8, %v528_v61 }
 0x4c3   :  { %1954 = vmatmul.msk.f32.vlgmr.msra.gmra.mxu3 %vm175_vm8, %v2410_v35 }
 0x4c4   :  { %767 = vmatpush.msra.mxu3 %v744_v26  ;;  %v839_v26 = vld [vmem:[%s2884_s10 + $0x18] sm:$0xff] }
 0x4c6   :  { %768 = vmatpush.msra.mxu3 %v743_v27  ;;  %v838_v27 = vld [vmem:[%s2884_s10 + $0x10] sm:$0xff] }
 0x4c8   :  { %769 = vmatpush.msra.mxu3 %v742_v29  ;;  %v836_v29 = vld [vmem:[%s2884_s10] sm:$0xff] }
 0x4c9   :  { %v526_v62 = vpop.permute.xlu0 %525 }
 0x4ca   :  { %1957 = vmatmul.msk.f32.vlgmr.msrb.gmra.mxu2 %vm175_vm8, %v526_v62  ;;  %770 = vmatpush.msra.mxu3 %v741_v43 }
 0x4cb   :  { %1960 = vmatmul.msk.f32.vlgmr.msrb.gmra.mxu3 %vm175_vm8, %v593_v63  ;;  %v2492_v63 = vld [vmem:[%s2881_s7] ss:$0 sm:$0xff] }
 0x4cc   :  { %659 = vrot.lane.b32.xlu1 %v2410_v35, %s2897_s21  ;;  %s2928_s21 = smov 80  }
 0x4d1   :  { %v662_v2 = vpop.permute.xlu0 %661 }
 0x4d2   :  { %1962 = vmatpush.xpose.msk.msra.mxu2 %vm175_vm8, %v662_v2 }
 0x4d9   :  { %v443_v0 = vpop.permute.xlu0 %442 }
 0x4da   :  { %v453_v44 = vsel %vm175_vm8, %v2415_v41, %v443_v0 }
 0x526   :  { %v412_v3 = vpop.xlane.xlu1 %411 }
 0x527   :  { %2089 = vrcp.f32 %v412_v3 }
 0x52d   :  { %v2090_v4 = vpop.eup %2089 }
 0x52e   :  { %v414_v5 = vmul.f32 %v2090_v4, %v2086_v54 }
 0x530   :  { %1952 = vmatmul.msk.f32.vlgmr.msrb.gmra.mxu1 %vm175_vm8, %v414_v5 }
 0x53e   :  { %v371_v6 = vpop.f32.mrf.mxu3  ;;  %v660_v7 = vpop.permute.xlu1 %659 }
 0x53f   :  { %446 = vrot.lane.b32.xlu2 %v371_v6, %s2913_s22  ;;  %1963 = vmatmul.msk.f32.vlgmr.msra.gmra.mxu2 %vm175_vm8, %v660_v7 }
 0x546   :  { %v482_v9 = vpop.f32.mrf.mxu3 }
 0x547   :  { %v485_v11 = vmul.f32 0.35355338, %v482_v9 }
 0x549   :  { %v487_v12 = vadd.f32 %v2448_v8, %v485_v11 }
 0x54b   :  { %v488_v13 = vsel %vm175_vm8, %v487_v12, -inf }
 0x54c   :  { %489 = vmax.xlane.f32.xlu0 %v488_v13 }
 0x54d   :  { %v550_v14 = vpop.f32.mrf.mxu2 }
 0x54e   :  { %v553_v15 = vmul.f32 0.35355338, %v550_v14  ;;  %v617_v31 = vpop.f32.mrf.mxu3 }
 0x54f   :  { %v620_v32 = vmul.f32 0.35355338, %v617_v31 }
 0x550   :  { %v554_v16 = vadd.f32 %v553_v15, %v2448_v8 }
 0x551   :  { %v621_v34 = vadd.f32 %v620_v32, %v2448_v8 }
 0x552   :  { %v555_v17 = vsel %vm175_vm8, %v554_v16, -inf }
 0x553   :  { %v622_v36 = vsel %vm175_vm8, %v621_v34, -inf }
 0x568   :  { %556 = vmax.xlane.f32.xlu2 %v555_v17 }
 0x599   :  { %v447_v33 = vpop.permute.xlu2 %446 }
 0x59a   :  { %v455_v45 = vsel %vm454_vm9, %v453_v44, %v447_v33  ;;  %v2526_v44 = vld [vmem:[%s2883_s9] ss:$0 sm:$0xff] }
 0x5ad   :  { %v438_v18 = vpop.f32.mrf.mxu1 }
 0x5ae   :  { %450 = vrot.lane.b32.xlu1 %v438_v18, %s2915_s23 }
 0x5bf   :  { %v490_v19 = vpop.xlane.xlu0 %489 }
 0x5c0   :  { %v491_v20 = vsub.f32 %v487_v12, %v490_v19 }
 0x5c2   :  { %v492_v21 = vmul.f32 1.442695, %v491_v20  ;;  %v684_v22 = vpop.f32.mrf.mxu2 }
 0x5c3   :  { %v687_v23 = vmul.f32 0.35355338, %v684_v22 }
 0x5c4   :  { %2091 = vpow2.f32 %v492_v21 }
 0x5c5   :  { %v688_v24 = vadd.f32 %v687_v23, %v2448_v8 }
 0x5c7   :  { %v689_v25 = vsel %vm175_vm8, %v688_v24, -inf }
 0x5c8   :  { %690 = vmax.xlane.f32.xlu2 %v689_v25 }
 0x5ca   :  { %v2092_v28 = vpop.eup %2091 }
 0x5cb   :  { %v494_v30 = vsel %vm175_vm8, %v2092_v28, 0.0 }
 0x5cc   :  { %495 = vadd.xlane.f32.xlu0 %v494_v30 }
 0x5d8   :  { %623 = vmax.xlane.f32.xlu1 %v622_v36 }
 0x5db   :  { %v557_v37 = vpop.xlane.xlu2 %556 }
 0x5dc   :  { %v558_v38 = vsub.f32 %v554_v16, %v557_v37 }
 0x5de   :  { %v559_v39 = vmul.f32 1.442695, %v558_v38 }
 0x5e0   :  { %2093 = vpow2.f32 %v559_v39  ;;  %499 = vrot.lane.b32.xlu0 %v2410_v35, %s2194_s4 }
 0x5e6   :  { %v2094_v40 = vpop.eup %2093 }
 0x5e7   :  { %v561_v42 = vsel %vm175_vm8, %v2094_v40, 0.0 }
 0x5e8   :  { %700 = vrot.lane.b32.xlu0 %v2410_v35, %s2201_s25  ;;  %562 = vadd.xlane.f32.xlu1 %v561_v42 }
 0x620   :  { %v451_v46 = vpop.permute.xlu1 %450 }
 0x621   :  { %v457_v47 = vsel %vm456_vm10, %v455_v45, %v451_v46 }
 0x622   :  { %1965 = vmatmul.msk.f32.vlgmr.msra.gmra.mxu3 %vm70_vm0, %v457_v47 }
 0x63b   :  { %v691_v48 = vpop.xlane.xlu2 %690 }
 0x63c   :  { %v692_v49 = vsub.f32 %v688_v24, %v691_v48 }
 0x63e   :  { %v693_v51 = vmul.f32 1.442695, %v692_v49 }
 0x63f   :  { %v496_v54 = vpop.xlane.xlu0 %495 }
 0x640   :  { %2095 = vpow2.f32 %v693_v51 }
 0x641   :  { %2097 = vrcp.f32 %v496_v54 }
 0x646   :  { %v2096_v53 = vpop.eup %2095 }
 0x647   :  { %v695_v55 = vsel %vm175_vm8, %v2096_v53, 0.0  ;;  %v2098_v58 = vpop.eup %2097 }
 0x648   :  { %696 = vadd.xlane.f32.xlu1 %v695_v55  ;;  %v498_v59 = vmul.f32 %v2098_v58, %v2092_v28  ;;  %v837_v28 = vld [vmem:[%s2884_s10 + $0x8] sm:$0xff]  ;;  %v898_v55 = vld [vmem:[%s2886_s12 + $0x38] sm:$0xff] }
 0x649   :  { %918 = vmatpush.msrb.mxu2 %v898_v55  ;;  %v894_v58 = vld [vmem:[%s2886_s12 + $0x18] sm:$0xff] }
 0x64b   :  { %v624_v56 = vpop.xlane.xlu1 %623 }
 0x64c   :  { %v625_v57 = vsub.f32 %v621_v34, %v624_v56  ;;  %v897_v56 = vld [vmem:[%s2886_s12 + $0x30] sm:$0xff] }
 0x64d   :  { %919 = vmatpush.msrb.mxu2 %v897_v56 }
 0x64e   :  { %v626_v41 = vmul.f32 1.442695, %v625_v57  ;;  %v896_v57 = vld [vmem:[%s2886_s12 + $0x28] sm:$0xff] }
 0x64f   :  { %920 = vmatpush.msrb.mxu2 %v896_v57 }
 0x650   :  { %2099 = vpow2.f32 %v626_v41  ;;  %v895_v41 = vld [vmem:[%s2886_s12 + $0x20] sm:$0xff] }
 0x651   :  { %921 = vmatpush.msrb.mxu2 %v895_v41 }
 0x652   :  { %v500_v60 = vpop.permute.xlu0 %499 }
 0x653   :  { %520 = vmatpush.msra.mxu0 %v500_v60  ;;  %922 = vmatpush.msrb.mxu2 %v894_v58  ;;  %v892_v60 = vld [vmem:[%s2886_s12 + $0x8] sm:$0xff]  ;;  %v2600_v58 = vld [vmem:[%s2888_s14] ss:$0 sm:$0xff] }
 0x654   :  { %1955 = vmatmul.msk.f32.vlgmr.msra.gmra.mxu0 %vm175_vm8, %v498_v59  ;;  %v893_v59 = vld [vmem:[%s2886_s12 + $0x10] sm:$0xff] }
 0x655   :  { %923 = vmatpush.msrb.mxu2 %v893_v59 }
 0x656   :  { %v2100_v61 = vpop.eup %2099 }
 0x657   :  { %v628_v62 = vsel %vm175_vm8, %v2100_v61, 0.0  ;;  %924 = vmatpush.msrb.mxu2 %v892_v60 }
 0x658   :  { %629 = vadd.xlane.f32.xlu2 %v628_v62  ;;  %v2562_v62 = vld [vmem:[%s2885_s11] ss:$0 sm:$0xff] }
 0x65a   :  { %v701_v16 = vpop.permute.xlu0 %700 }
 0x65b   :  { %v563_v6 = vpop.xlane.xlu1 %562 }
 0x65c   :  { %2101 = vrcp.f32 %v563_v6 }
 0x661   :  { %633 = vrot.lane.b32.xlu1 %v2410_v35, %s2911_s3  ;;  %s2930_s3 = smov 112  }
 0x662   :  { %v2102_v11 = vpop.eup %2101 }
 0x663   :  { %v565_v12 = vmul.f32 %v2102_v11, %v2094_v40  ;;  %v2521_v40 = vld [vmem:[%s2882_s8] ss:$0 sm:$0xff] }
 0x670   :  { %566 = vrot.lane.b32.xlu2 %v2410_v35, %s2200_s2 }
 0x6a5   :  { %v772_v2 = vpop.f32.mrf.mxu3 }
 0x6a6   :  { %v773_v3 = vadd.f32 %v2492_v63, %v772_v2 }
 0x6a8   :  { %v778_v4 = vadd.f32 %v773_v3, %v2346_v50 }
 0x6aa   :  { %v782_v5 = vsel %vm70_vm0, %v778_v4, 0.0 }
 0x6ab   :  { %783 = vadd.xlane.f32.xlu0 %v782_v5 }
 0x6bb   :  { %v697_v7 = vpop.xlane.xlu1 %696 }
 0x6cb   :  { %v630_v9 = vpop.xlane.xlu2 %629 }
 0x6cc   :  { %2103 = vrcp.f32 %v630_v9 }
 0x6cd   :  { %2105 = vrcp.f32 %v697_v7 }
 0x6d1   :  { %v522_v22 = vpop.f32.mrf.mxu0 }
 0x6d2   :  { %v2104_v35 = vpop.eup %2103 }
 0x6d3   :  { %v632_v13 = vmul.f32 %v2104_v35, %v2100_v61  ;;  %v567_v14 = vpop.permute.xlu2 %566  ;;  %v634_v15 = vpop.permute.xlu1 %633  ;;  %v891_v61 = vld [vmem:[%s2886_s12] sm:$0xff] }
 0x6d4   :  { %587 = vmatpush.msra.mxu1 %v567_v14  ;;  %654 = vmatpush.msrb.mxu0 %v634_v15  ;;  %v2106_v50 = vpop.eup %2105 }
 0x6d5   :  { %1958 = vmatmul.msk.f32.vlgmr.msra.gmra.mxu1 %vm175_vm8, %v565_v12  ;;  %1961 = vmatmul.msk.f32.vlgmr.msrb.gmra.mxu0 %vm175_vm8, %v632_v13  ;;  %v699_v17 = vmul.f32 %v2106_v50, %v2096_v53 }
 0x6d6   :  { %721 = vmatpush.msrb.mxu1 %v701_v16  ;;  %862 = vmatpush.msra.mxu0 %v839_v26 }
 0x6d7   :  { %925 = vmatpush.msrb.mxu2 %v891_v61  ;;  %v2605_v61 = vld [vmem:[%s2889_s15] ss:$0 sm:$0xff] }
 0x6d8   :  { %863 = vmatpush.msra.mxu0 %v838_v27 }
 0x6da   :  { %864 = vmatpush.msra.mxu0 %v837_v28 }
 0x6dc   :  { %865 = vmatpush.msra.mxu0 %v836_v29 }
 0x6dd   :  { %1964 = vmatmul.msk.f32.vlgmr.msrb.gmra.mxu1 %vm175_vm8, %v699_v17  ;;  %v2572_v17 = vld [vmem:[%s2887_s13] ss:$0 sm:$0xff] }
 0x71e   :  { %v784_v18 = vpop.xlane.xlu0 %783 }
 0x71f   :  { %v788_v0 = vmul.f32 %v784_v18, %v2320_v10 }
 0x721   :  { %v790_v19 = vsub.f32 %v778_v4, %v788_v0 }
 0x723   :  { %v792_v20 = vmul.f32 %v790_v19, %v790_v19 }
 0x725   :  { %v794_v21 = vsel %vm70_vm0, %v792_v20, 0.0 }
 0x726   :  { %795 = vadd.xlane.f32.xlu2 %v794_v21 }
 0x752   :  { %v589_v23 = vpop.f32.mrf.mxu1  ;;  %v656_v24 = vpop.f32.mrf.mxu0 }
 0x753   :  { %727 = vrot.lane.b32.xlu1 %v589_v23, %s2909_s1 }
 0x75a   :  { %v723_v25 = vpop.f32.mrf.mxu1 }
 0x75b   :  { %731 = vrot.lane.b32.xlu1 %v656_v24, %s2913_s22  ;;  %s2932_s22 = smov 104  }
 0x763   :  { %735 = vrot.lane.b32.xlu1 %v723_v25, %s2915_s23 }
 0x799   :  { %v796_v30 = vpop.xlane.xlu2 %795 }
 0x79a   :  { %v800_v31 = vmul.f32 %v796_v30, %v2320_v10 }
 0x79c   :  { %v802_v32 = vadd.f32 1e-12, %v800_v31 }
 0x79e   :  { %2107 = vrsqrt.f32 %v802_v32  ;;  %vm810_vm12 = vweird.f32 %v802_v32 }
 0x7a4   :  { %v2108_v33 = vpop.eup %2107 }
 0x7a5   :  { %v805_v34 = vmul.f32 %v2108_v33, %v802_v32  ;;  %vm811_vm11 = vweird.f32 %v2108_v33 }
 0x7a6   :  { %vm812_vm13 = vmor %vm810_vm12, %vm811_vm11 }
 0x7a7   :  { %v806_v36 = vmul.f32 %v2108_v33, %v805_v34 }
 0x7a9   :  { %v807_v37 = vmul.f32 0.5, %v806_v36 }
 0x7ab   :  { %v808_v38 = vsub.f32 1.5, %v807_v37 }
 0x7ad   :  { %v809_v39 = vmul.f32 %v2108_v33, %v808_v38 }
 0x7af   :  { %v813_v42 = vsel %vm812_vm13, %v2108_v33, %v809_v39 }
 0x7b0   :  { %v824_v43 = vmul.f32 %v813_v42, %v790_v19 }
 0x7b2   :  { %v829_v45 = vmul.f32 %v2521_v40, %v824_v43 }
 0x7b4   :  { %v834_v46 = vadd.f32 %v2526_v44, %v829_v45 }
 0x7b6   :  { %1967 = vmatmul.msk.f32.vlgmr.msra.gmra.mxu0 %vm70_vm0, %v834_v46 }
 0x7c5   :  { %v728_v47 = vpop.permute.xlu1 %727 }
 0x7c6   :  { %v738_v49 = vsel %vm175_vm8, %v522_v22, %v728_v47  ;;  %v1973_v47 = vld [vmem:[%s2923_s26 + $0x30] sm:$0xff] }
 0x7cd   :  { %v732_v48 = vpop.permute.xlu1 %731 }
 0x7ce   :  { %v739_v51 = vsel %vm454_vm9, %v738_v49, %v732_v48  ;;  %v1972_v48 = vld [vmem:[%s2923_s26 + $0x28] sm:$0xff] }
 0x7d5   :  { %v736_v53 = vpop.permute.xlu1 %735 }
 0x7d6   :  { %v740_v54 = vsel %vm456_vm10, %v739_v51, %v736_v53 }
 0x7d7   :  { %1966 = vmatmul.msk.f32.gmra.mxu3 %vm70_vm0, %v740_v54 }
 0x833   :  { %v867_v2 = vpop.f32.mrf.mxu0 }
 0x834   :  { %v868_v3 = vadd.f32 %v2562_v62, %v867_v2 }
 0x836   :  { %v875_v4 = vmul.f32 0.044715, %v868_v3  ;;  %v873_v35 = vmul.f32 0.5, %v868_v3 }
 0x838   :  { %v877_v5 = vmul.f32 %v875_v4, %v868_v3 }
 0x83a   :  { %v879_v6 = vmul.f32 %v877_v5, %v868_v3 }
 0x83c   :  { %v881_v7 = vadd.f32 %v879_v6, %v868_v3 }
 0x83e   :  { %v883_v9 = vmul.f32 0.7978846, %v881_v7 }
 0x840   :  { %2109 = vtanh.f32 %v883_v9 }
 0x846   :  { %v2110_v11 = vpop.eup %2109 }
 0x847   :  { %v887_v12 = vadd.f32 1.0, %v2110_v11 }
 0x849   :  { %v889_v13 = vmul.f32 %v887_v12, %v873_v35 }
 0x84b   :  { %1969 = vmatmul.msk.f32.vlgmr.msrb.gmra.mxu2 %vm903_vm14, %v889_v13 }
 0x85a   :  { %v775_v14 = vpop.f32.mrf.mxu3 }
 0x85b   :  { %v776_v15 = vadd.f32 %v2492_v63, %v775_v14 }
 0x85d   :  { %v779_v16 = vadd.f32 %v776_v15, %v2350_v52 }
 0x85f   :  { %v785_v50 = vsel %vm70_vm0, %v779_v16, 0.0 }
 0x860   :  { %786 = vadd.xlane.f32.xlu1 %v785_v50 }
 0x8ce   :  { %v927_v18 = vpop.f32.mrf.mxu2 }
 0x8cf   :  { %v928_v0 = vadd.f32 %v2572_v17, %v927_v18 }
 0x8d1   :  { %v933_v19 = vadd.f32 %v928_v0, %v834_v46  ;;  %v1974_v46 = vld [vmem:[%s2923_s26 + $0x38] sm:$0xff] }
 0x8d2   :  { %1019 = vmatpush.msra.mxu1 %v1974_v46 }
 0x8d3   :  { %v787_v20 = vpop.xlane.xlu1 %786  ;;  %v937_v21 = vsel %vm70_vm0, %v933_v19, 0.0 }
 0x8d4   :  { %v789_v22 = vmul.f32 %v787_v20, %v2320_v10  ;;  %938 = vadd.xlane.f32.xlu2 %v937_v21  ;;  %1020 = vmatpush.msra.mxu1 %v1973_v47 }
 0x8d6   :  { %v791_v63 = vsub.f32 %v779_v16, %v789_v22  ;;  %1021 = vmatpush.msra.mxu1 %v1972_v48  ;;  %v2059_v16 = vld [vmem:[%s2879_s5 + $0x1] ss:$0 sm:$0xff]  ;;  %s2931_s5 = smov 120  }
 0x8d8   :  { %v793_v52 = vmul.f32 %v791_v63, %v791_v63 }
 0x8da   :  { %v797_v23 = vsel %vm70_vm0, %v793_v52, 0.0 }
 0x8db   :  { %798 = vadd.xlane.f32.xlu0 %v797_v23 }
 0x947   :  { %v939_v24 = vpop.xlane.xlu2 %938 }
 0x948   :  { %v943_v25 = vmul.f32 %v939_v24, %v2320_v10 }
 0x94a   :  { %v945_v26 = vsub.f32 %v933_v19, %v943_v25 }
 0x94c   :  { %v947_v27 = vmul.f32 %v945_v26, %v945_v26 }
 0x94e   :  { %v799_v28 = vpop.xlane.xlu0 %798  ;;  %v949_v29 = vsel %vm70_vm0, %v947_v27, 0.0 }
 0x94f   :  { %v801_v30 = vmul.f32 %v799_v28, %v2320_v10  ;;  %950 = vadd.xlane.f32.xlu0 %v949_v29 }
 0x951   :  { %v803_v31 = vadd.f32 1e-12, %v801_v30 }
 0x953   :  { %2111 = vrsqrt.f32 %v803_v31  ;;  %vm820_vm1 = vweird.f32 %v803_v31 }
 0x959   :  { %v2112_v32 = vpop.eup %2111 }
 0x95a   :  { %v815_v33 = vmul.f32 %v2112_v32, %v803_v31  ;;  %vm821_vm15 = vweird.f32 %v2112_v32 }
 0x95b   :  { %vm822_vm2 = vmor %vm820_vm1, %vm821_vm15 }
 0x95c   :  { %v816_v34 = vmul.f32 %v2112_v32, %v815_v33 }
 0x95e   :  { %v817_v36 = vmul.f32 0.5, %v816_v34 }
 0x960   :  { %v818_v37 = vsub.f32 1.5, %v817_v36 }
 0x962   :  { %v819_v38 = vmul.f32 %v2112_v32, %v818_v37 }
 0x964   :  { %v823_v39 = vsel %vm822_vm2, %v2112_v32, %v819_v38 }
 0x965   :  { %v825_v42 = vmul.f32 %v823_v39, %v791_v63 }
 0x967   :  { %v830_v43 = vmul.f32 %v2521_v40, %v825_v42  ;;  %v1971_v40 = vld [vmem:[%s2923_s26 + $0x20] sm:$0xff] }
 0x968   :  { %1022 = vmatpush.msra.mxu1 %v1971_v40 }
 0x969   :  { %v835_v45 = vadd.f32 %v2526_v44, %v830_v43 }
 0x96b   :  { %1968 = vmatmul.msk.f32.gmra.mxu0 %vm70_vm0, %v835_v45 }
 0x9c2   :  { %v951_v44 = vpop.xlane.xlu0 %950 }
 0x9c3   :  { %v955_v49 = vmul.f32 %v951_v44, %v2320_v10 }
 0x9c5   :  { %v957_v51 = vadd.f32 1e-12, %v955_v49 }
 0x9c7   :  { %2113 = vrsqrt.f32 %v957_v51  ;;  %vm965_vm4 = vweird.f32 %v957_v51 }
 0x9cd   :  { %v2114_v53 = vpop.eup %2113 }
 0x9ce   :  { %v960_v54 = vmul.f32 %v2114_v53, %v957_v51  ;;  %vm966_vm3 = vweird.f32 %v2114_v53 }
 0x9cf   :  { %vm967_vm5 = vmor %vm965_vm4, %vm966_vm3 }
 0x9d0   :  { %v961_v55 = vmul.f32 %v2114_v53, %v960_v54 }
 0x9d2   :  { %v962_v56 = vmul.f32 0.5, %v961_v55 }
 0x9d4   :  { %v963_v57 = vsub.f32 1.5, %v962_v56 }
 0x9d6   :  { %v964_v41 = vmul.f32 %v2114_v53, %v963_v57 }
 0x9d8   :  { %v968_v59 = vsel %vm967_vm5, %v2114_v53, %v964_v41 }
 0x9d9   :  { %v979_v60 = vmul.f32 %v968_v59, %v945_v26 }
 0x9db   :  { %v984_v2 = vmul.f32 %v2600_v58, %v979_v60 }
 0x9dd   :  { %v2609_v3 = vadd.f32 %v2605_v61, %v984_v2 }
 0x9df   :  { %1976 = vmatmul.msk.f32.vlgmr.msra.gmra.mxu1 %vm70_vm0, %v2609_v3 }
 0x9e8   :  { %v870_v4 = vpop.f32.mrf.mxu0 }
 0x9e9   :  { %v871_v5 = vadd.f32 %v2562_v62, %v870_v4 }
 0x9eb   :  { %v876_v6 = vmul.f32 0.044715, %v871_v5  ;;  %v874_v13 = vmul.f32 0.5, %v871_v5 }
 0x9ed   :  { %v878_v7 = vmul.f32 %v876_v6, %v871_v5 }
 0x9ef   :  { %v880_v9 = vmul.f32 %v878_v7, %v871_v5 }
 0x9f1   :  { %v882_v11 = vadd.f32 %v880_v9, %v871_v5 }
 0x9f3   :  { %v884_v35 = vmul.f32 0.7978846, %v882_v11 }
 0x9f5   :  { %2115 = vtanh.f32 %v884_v35 }
 0x9fb   :  { %v2116_v12 = vpop.eup %2115 }
 0x9fc   :  { %v888_v14 = vadd.f32 1.0, %v2116_v12 }
 0x9fe   :  { %v890_v15 = vmul.f32 %v888_v14, %v874_v13 }
 0xa00   :  { %1970 = vmatmul.msk.f32.gmra.mxu2 %vm903_vm14, %v890_v15 }
 0xa5c   :  { %v1024_v50 = vpop.f32.mrf.mxu1 }
 0xa5d   :  { %v2618_v18 = vadd.f32 %v2059_v16, %v1024_v50 }
 0xa5f   :  { %1031 = vrot.lane.b32.xlu2 %v2618_v18, %s2193_s28 }
 0xa67   :  { %1098 = vrot.lane.b32.xlu2 %v2618_v18, %s2927_s0 }
 0xa6f   :  { %1165 = vrot.lane.b32.xlu2 %v2618_v18, %s2928_s21 }
 0xa77   :  { %1232 = vrot.lane.b32.xlu2 %v2618_v18, %s2929_s24 }
 0xa7f   :  { %1163 = vrot.lane.b32.xlu2 %v2618_v18, %s2930_s3 }
 0xa83   :  { %v930_v62 = vpop.f32.mrf.mxu2 }
 0xa84   :  { %v931_v0 = vadd.f32 %v2572_v17, %v930_v62 }
 0xa86   :  { %v934_v19 = vadd.f32 %v931_v0, %v835_v45 }
 0xa88   :  { %v940_v20 = vsel %vm70_vm0, %v934_v19, 0.0 }
 0xa89   :  { %941 = vadd.xlane.f32.xlu0 %v940_v20 }
 0xab9   :  { %v1032_v21 = vpop.permute.xlu2 %1031 }
 0xaba   :  { %1978 = vmatpush.xpose.msk.msrb.mxu3 %vm175_vm8, %v1032_v21 }
 0xabd   :  { %1979 = vmatmul.msk.f32.vlgmr.msrb.gmra.mxu3 %vm175_vm8, %v2618_v18 }
 0xac1   :  { %v1099_v22 = vpop.permute.xlu2 %1098 }
 0xac2   :  { %1981 = vmatpush.xpose.msk.msrb.mxu1 %vm175_vm8, %v1099_v22 }
 0xac9   :  { %v1166_v63 = vpop.permute.xlu2 %1165 }
 0xad1   :  { %v1233_v52 = vpop.permute.xlu2 %1232 }
 0xad2   :  { %1987 = vmatpush.xpose.msk.msra.mxu1 %vm175_vm8, %v1233_v52 }
 0xad9   :  { %v1164_v6 = vpop.permute.xlu2 %1163 }
 0xafc   :  { %v942_v23 = vpop.xlane.xlu0 %941 }
 0xafd   :  { %v944_v17 = vmul.f32 %v942_v23, %v2320_v10 }
 0xaff   :  { %v946_v24 = vsub.f32 %v934_v19, %v944_v17 }
 0xb01   :  { %v948_v25 = vmul.f32 %v946_v24, %v946_v24 }
 0xb03   :  { %v952_v26 = vsel %vm70_vm0, %v948_v25, 0.0 }
 0xb04   :  { %953 = vadd.xlane.f32.xlu0 %v952_v26 }
 0xb18   :  { %1096 = vrot.lane.b32.xlu0 %v2618_v18, %s2931_s5 }
 0xb20   :  { %1230 = vrot.lane.b32.xlu0 %v2618_v18, %s2932_s22 }
 0xb40   :  { %v1054_v27 = vpop.f32.mrf.mxu3 }
 0xb41   :  { %v1057_v28 = vmul.f32 0.35355338, %v1054_v27 }
 0xb43   :  { %v1058_v29 = vadd.f32 %v1057_v28, %v2388_v1 }
 0xb45   :  { %v1059_v30 = vsel %vm175_vm8, %v1058_v29, -inf }
 0xb46   :  { %1060 = vmax.xlane.f32.xlu1 %v1059_v30 }
 0xb5f   :  { %1070 = vrot.lane.b32.xlu1 %v2618_v18, %s2194_s4 }
 0xb77   :  { %v954_v31 = vpop.xlane.xlu0 %953 }
 0xb78   :  { %v956_v32 = vmul.f32 %v954_v31, %v2320_v10 }
 0xb7a   :  { %v958_v33 = vadd.f32 1e-12, %v956_v32 }
 0xb7c   :  { %2117 = vrsqrt.f32 %v958_v33  ;;  %vm975_vm7 = vweird.f32 %v958_v33 }
 0xb82   :  { %v2118_v34 = vpop.eup %2117 }
 0xb83   :  { %v970_v36 = vmul.f32 %v2118_v34, %v958_v33  ;;  %vm976_vm6 = vweird.f32 %v2118_v34 }
 0xb84   :  { %vm977_vm11 = vmor %vm975_vm7, %vm976_vm6  ;;  %vm1856_vm6 = vcmask 1040384   ;;  %vm1921_vm7 = vcmask 9216  }
 0xb85   :  { %v971_v37 = vmul.f32 %v2118_v34, %v970_v36 }
 0xb87   :  { %v972_v38 = vmul.f32 0.5, %v971_v37 }
 0xb89   :  { %v973_v39 = vsub.f32 1.5, %v972_v38 }
 0xb8a   :  { %v1097_v48 = vpop.permute.xlu0 %1096 }
 0xb8b   :  { %v974_v42 = vmul.f32 %v2118_v34, %v973_v39 }
 0xb8d   :  { %v978_v43 = vsel %vm977_vm11, %v2118_v34, %v974_v42 }
 0xb8e   :  { %v980_v45 = vmul.f32 %v978_v43, %v946_v24 }
 0xb90   :  { %v985_v46 = vmul.f32 %v2600_v58, %v980_v45 }
 0xb92   :  { %v2650_v47 = vadd.f32 %v2605_v61, %v985_v46  ;;  %v1231_v40 = vpop.permute.xlu0 %1230 }
 0xb94   :  { %1977 = vmatmul.msk.f32.gmra.mxu1 %vm70_vm0, %v2650_v47 }
 0xb9c   :  { %1982 = vmatmul.msk.f32.vlgmr.msrb.gmra.mxu1 %vm175_vm8, %v1097_v48 }
 0xba4   :  { %1988 = vmatmul.msk.f32.vlgmr.msra.gmra.mxu1 %vm175_vm8, %v1231_v40 }
 0xbb9   :  { %v1061_v44 = vpop.xlane.xlu1 %1060 }
 0xbba   :  { %v1062_v54 = vsub.f32 %v1058_v29, %v1061_v44 }
 0xbbc   :  { %v1063_v55 = vmul.f32 1.442695, %v1062_v54 }
 0xbbe   :  { %2119 = vpow2.f32 %v1063_v55 }
 0xbc4   :  { %v2120_v57 = vpop.eup %2119 }
 0xbc5   :  { %v1065_v58 = vsel %vm175_vm8, %v2120_v57, 0.0 }
 0xbd1   :  { %v1071_v49 = vpop.permute.xlu1 %1070 }
 0xbd2   :  { %1091 = vmatpush.msrb.mxu0 %v1071_v49 }
 0xbd4   :  { %1984 = vmatpush.xpose.msk.msra.mxu0 %vm175_vm8, %v1166_v63 }
 0xc11   :  { %v1027_v51 = vpop.f32.mrf.mxu1 }
 0xc12   :  { %v2657_v53 = vadd.f32 %v2059_v16, %v1027_v51 }
 0xc14   :  { %1378 = vrot.lane.b32.xlu0 %v2657_v53, %s2931_s5  ;;  %1380 = vrot.lane.b32.xlu2 %v2657_v53, %s2927_s0 }
 0xc15   :  { %1313 = vrot.lane.b32.xlu1 %v2657_v53, %s2193_s28  ;;  %s2933_s28 = smov 48  }
 0xc19   :  { %v1121_v56 = vpop.f32.mrf.mxu1 }
 0xc1a   :  { %v1124_v41 = vmul.f32 0.35355338, %v1121_v56 }
 0xc1c   :  { %1514 = vrot.lane.b32.xlu2 %v2657_v53, %s2929_s24  ;;  %v1125_v59 = vadd.f32 %v1124_v41, %v2388_v1 }
 0xc1d   :  { %1447 = vrot.lane.b32.xlu1 %v2657_v53, %s2928_s21 }
 0xc1e   :  { %v1126_v61 = vsel %vm175_vm8, %v1125_v59, -inf }
 0xc21   :  { %v1255_v60 = vpop.f32.mrf.mxu1 }
 0xc22   :  { %v1258_v2 = vmul.f32 0.35355338, %v1255_v60 }
 0xc24   :  { %v1259_v4 = vadd.f32 %v1258_v2, %v2388_v1 }
 0xc25   :  { %1512 = vrot.lane.b32.xlu1 %v2657_v53, %s2932_s22 }
 0xc26   :  { %v1260_v5 = vsel %vm175_vm8, %v1259_v4, -inf }
 0xc3e   :  { %1066 = vadd.xlane.f32.xlu0 %v1065_v58 }
 0xc45   :  { %1127 = vmax.xlane.f32.xlu2 %v1126_v61 }
 0xc4f   :  { %1261 = vmax.xlane.f32.xlu1 %v1260_v5 }
 0xc52   :  { %1445 = vrot.lane.b32.xlu0 %v2657_v53, %s2930_s3 }
 0xc6e   :  { %v1381_v7 = vpop.permute.xlu2 %1380 }
 0xc6f   :  { %1993 = vmatpush.xpose.msk.msrb.mxu1 %vm175_vm8, %v1381_v7 }
 0xc76   :  { %v1515_v9 = vpop.permute.xlu2 %1514 }
 0xc77   :  { %1999 = vmatpush.xpose.msk.msra.mxu1 %vm175_vm8, %v1515_v9 }
 0xc86   :  { %v1379_v11 = vpop.permute.xlu0 %1378 }
 0xc87   :  { %v1314_v35 = vpop.permute.xlu1 %1313  ;;  %1994 = vmatmul.msk.f32.vlgmr.msrb.gmra.mxu1 %vm175_vm8, %v1379_v11 }
 0xc8f   :  { %v1448_v12 = vpop.permute.xlu1 %1447 }
 0xc97   :  { %v1513_v13 = vpop.permute.xlu1 %1512 }
 0xc98   :  { %2000 = vmatmul.msk.f32.vlgmr.msra.gmra.mxu1 %vm175_vm8, %v1513_v13 }
 0xcb1   :  { %v1067_v14 = vpop.xlane.xlu0 %1066 }
 0xcb2   :  { %2121 = vrcp.f32 %v1067_v14 }
 0xcb8   :  { %v2122_v15 = vpop.eup %2121  ;;  %v1128_v19 = vpop.xlane.xlu2 %1127 }
 0xcb9   :  { %v1069_v16 = vmul.f32 %v2122_v15, %v2120_v57  ;;  %v1129_v63 = vsub.f32 %v1125_v59, %v1128_v19 }
 0xcbb   :  { %1980 = vmatmul.msk.f32.vlgmr.msrb.gmra.mxu0 %vm175_vm8, %v1069_v16  ;;  %v1130_v17 = vmul.f32 1.442695, %v1129_v63 }
 0xcbc   :  { %1990 = vmatpush.xpose.msk.msrb.mxu0 %vm175_vm8, %v1314_v35 }
 0xcbd   :  { %2123 = vpow2.f32 %v1130_v17 }
 0xcc2   :  { %v1262_v25 = vpop.xlane.xlu1 %1261 }
 0xcc3   :  { %1985 = vmatmul.msk.f32.vlgmr.msra.gmra.mxu0 %vm175_vm8, %v1164_v6  ;;  %v1263_v30 = vsub.f32 %v1259_v4, %v1262_v25  ;;  %v2124_v36 = vpop.eup %2123 }
 0xcc4   :  { %1996 = vmatpush.xpose.msk.msra.mxu0 %vm175_vm8, %v1448_v12  ;;  %v1446_v50 = vpop.permute.xlu0 %1445  ;;  %v1132_v38 = vsel %vm175_vm8, %v2124_v36, 0.0 }
 0xcc5   :  { %v1264_v33 = vmul.f32 1.442695, %v1263_v30 }
 0xcc7   :  { %2125 = vpow2.f32 %v1264_v33 }
 0xccb   :  { %1991 = vmatmul.msk.f32.vlgmr.msrb.gmra.mxu0 %vm175_vm8, %v2657_v53 }
 0xccd   :  { %v2126_v39 = vpop.eup %2125 }
 0xcce   :  { %v1266_v42 = vsel %vm175_vm8, %v2126_v39, 0.0 }
 0xcd3   :  { %1997 = vmatmul.msk.f32.vlgmr.msra.gmra.mxu0 %vm175_vm8, %v1446_v50 }
 0xd04   :  { %v1403_v21 = vpop.f32.mrf.mxu1 }
 0xd05   :  { %v1406_v52 = vmul.f32 0.35355338, %v1403_v21 }
 0xd07   :  { %v1407_v27 = vadd.f32 %v1406_v52, %v2448_v8 }
 0xd15   :  { %v1537_v28 = vpop.f32.mrf.mxu1 }
 0xd16   :  { %v1540_v31 = vmul.f32 0.35355338, %v1537_v28 }
 0xd18   :  { %v1541_v34 = vadd.f32 %v1540_v31, %v2448_v8 }
 0xd1a   :  { %v1542_v37 = vsel %vm175_vm8, %v1541_v34, -inf }
 0xd38   :  { %v2689_v62 = vpop.f32.mrf.mxu0 }
 0xd40   :  { %v1188_v0 = vpop.f32.mrf.mxu0 }
 0xd41   :  { %v1191_v20 = vmul.f32 0.35355338, %v1188_v0 }
 0xd43   :  { %v1192_v22 = vadd.f32 %v1191_v20, %v2388_v1  ;;  %v1408_v1 = vsel %vm175_vm8, %v1407_v27, -inf }
 0xd45   :  { %v1193_v23 = vsel %vm175_vm8, %v1192_v22, -inf }
 0xd46   :  { %1194 = vmax.xlane.f32.xlu0 %v1193_v23 }
 0xd48   :  { %v1336_v24 = vpop.f32.mrf.mxu0 }
 0xd49   :  { %v1339_v26 = vmul.f32 0.35355338, %v1336_v24 }
 0xd4b   :  { %v1340_v29 = vadd.f32 %v1339_v26, %v2448_v8 }
 0xd4d   :  { %v1341_v32 = vsel %vm175_vm8, %v1340_v29, -inf }
 0xd4e   :  { %1342 = vmax.xlane.f32.xlu2 %v1341_v32  ;;  %1409 = vmax.xlane.f32.xlu0 %v1408_v1 }
 0xd50   :  { %v1470_v57 = vpop.f32.mrf.mxu0 }
 0xd51   :  { %v1473_v60 = vmul.f32 0.35355338, %v1470_v57 }
 0xd53   :  { %v1474_v5 = vadd.f32 %v1473_v60, %v2448_v8 }
 0xd55   :  { %v1475_v11 = vsel %vm175_vm8, %v1474_v5, -inf }
 0xd56   :  { %1543 = vmax.xlane.f32.xlu2 %v1542_v37  ;;  %1133 = vadd.xlane.f32.xlu0 %v1132_v38  ;;  %v2003_v38 = vld [vmem:[%s2880_s6 + $0x28] sm:$0xff] }
 0xd5e   :  { %1267 = vadd.xlane.f32.xlu2 %v1266_v42 }
 0xd6a   :  { %1137 = vrot.lane.b32.xlu0 %v2618_v18, %s2200_s2 }
 0xd72   :  { %1271 = vrot.lane.b32.xlu0 %v2618_v18, %s2201_s25 }
 0xd76   :  { %1204 = vrot.lane.b32.xlu2 %v2618_v18, %s2933_s28 }
 0xd7a   :  { %1352 = vrot.lane.b32.xlu0 %v2657_v53, %s2194_s4  ;;  %s2934_s4 = smov 8  }
 0xd7e   :  { %1419 = vrot.lane.b32.xlu2 %v2657_v53, %s2200_s2  ;;  %s2935_s2 = smov 24  }
 0xd82   :  { %1486 = vrot.lane.b32.xlu0 %v2657_v53, %s2933_s28 }
 0xdb9   :  { %v1195_v43 = vpop.xlane.xlu0 %1194 }
 0xdba   :  { %v1196_v58 = vsub.f32 %v1192_v22, %v1195_v43 }
 0xdbc   :  { %v1197_v2 = vmul.f32 1.442695, %v1196_v58  ;;  %v2060_v58 = vld [vmem:[%s2881_s7 + $0x1] ss:$0 sm:$0xff] }
 0xdc1   :  { %v1343_v45 = vpop.xlane.xlu2 %1342  ;;  %v1410_v46 = vpop.xlane.xlu0 %1409 }
 0xdc2   :  { %v1411_v48 = vsub.f32 %v1407_v27, %v1410_v46  ;;  %v1344_v9 = vsub.f32 %v1340_v29, %v1343_v45 }
 0xdc4   :  { %v1412_v40 = vmul.f32 1.442695, %v1411_v48  ;;  %v1345_v12 = vmul.f32 1.442695, %v1344_v9 }
 0xdc6   :  { %2127 = vpow2.f32 %v1412_v40  ;;  %v2002_v40 = vld [vmem:[%s2880_s6 + $0x20] sm:$0xff] }
 0xdc9   :  { %v1544_v44 = vpop.xlane.xlu2 %1543  ;;  %v1134_v55 = vpop.xlane.xlu0 %1133 }
 0xdca   :  { %v1545_v49 = vsub.f32 %v1541_v34, %v1544_v44  ;;  %v2005_v34 = vld [vmem:[%s2880_s6 + $0x38] sm:$0xff] }
 0xdcb   :  { %1622 = vmatpush.msrb.mxu0 %v2005_v34 }
 0xdcc   :  { %v1546_v51 = vmul.f32 1.442695, %v1545_v49  ;;  %v2128_v54 = vpop.eup %2127 }
 0xdcd   :  { %v1414_v18 = vsel %vm175_vm8, %v2128_v54, 0.0 }
 0xdce   :  { %2129 = vpow2.f32 %v1546_v51  ;;  %1415 = vadd.xlane.f32.xlu1 %v1414_v18 }
 0xdcf   :  { %2131 = vrcp.f32 %v1134_v55 }
 0xdd1   :  { %v1268_v56 = vpop.xlane.xlu2 %1267 }
 0xdd2   :  { %2133 = vrcp.f32 %v1268_v56 }
 0xdd3   :  { %2135 = vpow2.f32 %v1197_v2 }
 0xdd4   :  { %v2714_v41 = vpop.eup %2129  ;;  %2137 = vpow2.f32 %v1345_v12 }
 0xdd5   :  { %v1548_v59 = vsel %vm175_vm8, %v2714_v41, 0.0  ;;  %v2132_v61 = vpop.eup %2131 }
 0xdd6   :  { %1549 = vadd.xlane.f32.xlu1 %v1548_v59  ;;  %v1136_v6 = vmul.f32 %v2132_v61, %v2124_v36  ;;  %v2004_v36 = vld [vmem:[%s2880_s6 + $0x30] sm:$0xff] }
 0xdd7   :  { %1623 = vmatpush.msrb.mxu0 %v2004_v36 }
 0xdd8   :  { %v2134_v35 = vpop.eup %2133 }
 0xdd9   :  { %v1205_v4 = vpop.permute.xlu2 %1204  ;;  %v2136_v13 = vpop.eup %2135  ;;  %v1270_v14 = vmul.f32 %v2134_v35, %v2126_v39  ;;  %1624 = vmatpush.msrb.mxu0 %v2003_v38 }
 0xdda   :  { %1225 = vmatpush.msra.mxu2 %v1205_v4  ;;  %v1199_v8 = vsel %vm175_vm8, %v2136_v13, 0.0  ;;  %v2138_v50 = vpop.eup %2137 }
 0xddb   :  { %v1347_v19 = vsel %vm175_vm8, %v2138_v50, 0.0  ;;  %1625 = vmatpush.msrb.mxu0 %v2002_v40 }
 0xddc   :  { %v1138_v7 = vpop.permute.xlu0 %1137 }
 0xddd   :  { %1158 = vmatpush.msra.mxu3 %v1138_v7 }
 0xdde   :  { %1983 = vmatmul.msk.f32.vlgmr.msra.gmra.mxu3 %vm175_vm8, %v1136_v6  ;;  %1476 = vmax.xlane.f32.xlu1 %v1475_v11 }
 0xde1   :  { %v1420_v16 = vpop.permute.xlu2 %1419 }
 0xde4   :  { %v1272_v15 = vpop.permute.xlu0 %1271 }
 0xde5   :  { %1292 = vmatpush.msrb.mxu3 %v1272_v15 }
 0xde6   :  { %1989 = vmatmul.msk.f32.vlgmr.msrb.gmra.mxu3 %vm175_vm8, %v1270_v14  ;;  %1200 = vadd.xlane.f32.xlu1 %v1199_v8 }
 0xde7   :  { %1440 = vmatpush.msra.mxu3 %v1420_v16 }
 0xdec   :  { %v1353_v0 = vpop.permute.xlu0 %1352 }
 0xded   :  { %1373 = vmatpush.msrb.mxu2 %v1353_v0  ;;  %v2013_v0 = vld [vmem:[%s2884_s10 + $0x30] sm:$0xff] }
 0xdee   :  { %1348 = vadd.xlane.f32.xlu1 %v1347_v19  ;;  %v2012_v19 = vld [vmem:[%s2884_s10 + $0x28] sm:$0xff] }
 0xdf4   :  { %v1487_v31 = vpop.permute.xlu0 %1486 }
 0xe41   :  { %v1416_v20 = vpop.xlane.xlu1 %1415 }
 0xe42   :  { %2139 = vrcp.f32 %v1416_v20 }
 0xe48   :  { %v2140_v21 = vpop.eup %2139 }
 0xe49   :  { %v1418_v22 = vmul.f32 %v2140_v21, %v2128_v54  ;;  %v1550_v63 = vpop.xlane.xlu1 %1549 }
 0xe4b   :  { %1995 = vmatmul.msk.f32.vlgmr.msra.gmra.mxu3 %vm175_vm8, %v1418_v22 }
 0xe51   :  { %v1477_v52 = vpop.xlane.xlu1 %1476 }
 0xe52   :  { %v1478_v23 = vsub.f32 %v1474_v5, %v1477_v52 }
 0xe54   :  { %v1479_v17 = vmul.f32 1.442695, %v1478_v23 }
 0xe56   :  { %2141 = vpow2.f32 %v1479_v17 }
 0xe59   :  { %v1201_v24 = vpop.xlane.xlu1 %1200 }
 0xe5a   :  { %2143 = vrcp.f32 %v1201_v24 }
 0xe5c   :  { %v2142_v25 = vpop.eup %2141 }
 0xe5d   :  { %v1481_v26 = vsel %vm175_vm8, %v2142_v25, 0.0 }
 0xe5e   :  { %1482 = vadd.xlane.f32.xlu1 %v1481_v26 }
 0xe60   :  { %v2144_v27 = vpop.eup %2143 }
 0xe61   :  { %v1160_v28 = vpop.f32.mrf.mxu3  ;;  %v1203_v29 = vmul.f32 %v2144_v27, %v2136_v13  ;;  %v1349_v30 = vpop.xlane.xlu1 %1348 }
 0xe62   :  { %1298 = vrot.lane.b32.xlu2 %v1160_v28, %s2934_s4  ;;  %2145 = vrcp.f32 %v1349_v30 }
 0xe63   :  { %1986 = vmatmul.msk.f32.vlgmr.msra.gmra.mxu2 %vm175_vm8, %v1203_v29 }
 0xe64   :  { %1507 = vmatpush.msra.mxu2 %v1487_v31  ;;  %v2061_v31 = vld [vmem:[%s2882_s8 + $0x1] ss:$0 sm:$0xff] }
 0xe68   :  { %v2146_v32 = vpop.eup %2145 }
 0xe69   :  { %v1294_v1 = vpop.f32.mrf.mxu3  ;;  %v1351_v33 = vmul.f32 %v2146_v32, %v2138_v50  ;;  %v2014_v50 = vld [vmem:[%s2884_s10 + $0x38] sm:$0xff] }
 0xe6a   :  { %1306 = vrot.lane.b32.xlu2 %v1294_v1, %s2935_s2 }
 0xe6b   :  { %1992 = vmatmul.msk.f32.vlgmr.msrb.gmra.mxu2 %vm175_vm8, %v1351_v33  ;;  %v2062_v33 = vld [vmem:[%s2883_s9 + $0x1] ss:$0 sm:$0xff] }
 0xe6c   :  { %1721 = vmatpush.msrb.mxu2 %v2014_v50  ;;  %v2064_v50 = vld [vmem:[%s2887_s13 + $0x1] ss:$0 sm:$0xff]  ;;  %s1930_s13 = sshll.u32 %s2894_s20, 4  ;;  %s1931_s13 = int_to_ptr.hbm [resolvable:$true] %s1930_s13 }
 0xe6e   :  { %1722 = vmatpush.msrb.mxu2 %v2013_v0 }
 0xe70   :  { %1723 = vmatpush.msrb.mxu2 %v2012_v19 }
 0xe77   :  { %1553 = vrot.lane.b32.xlu1 %v2657_v53, %s2201_s25  ;;  %s2936_s25 = smov 16  }
 0xebc   :  { %v1299_v44 = vpop.permute.xlu2 %1298 }
 0xebd   :  { %v1309_v51 = vsel %vm175_vm8, %v2689_v62, %v1299_v44 }
 0xec4   :  { %v1307_v18 = vpop.permute.xlu2 %1306 }
 0xece   :  { %v1442_v48 = vpop.f32.mrf.mxu3 }
 0xed1   :  { %v1483_v37 = vpop.xlane.xlu1 %1482 }
 0xed2   :  { %2147 = vrcp.f32 %v1483_v37 }
 0xed3   :  { %2149 = vrcp.f32 %v1550_v63 }
 0xed8   :  { %v2148_v39 = vpop.eup %2147 }
 0xed9   :  { %v1485_v42 = vmul.f32 %v2148_v39, %v2142_v25  ;;  %v2150_v53 = vpop.eup %2149  ;;  %v2025_v39 = vld [vmem:[%s2886_s12 + $0x78] sm:$0xff] }
 0xeda   :  { %v1552_v45 = vmul.f32 %v2150_v53, %v2714_v41  ;;  %1778 = vmatpush.msrb.mxu1 %v2025_v39  ;;  %v2024_v53 = vld [vmem:[%s2886_s12 + $0x70] sm:$0xff] }
 0xedb   :  { %1998 = vmatmul.msk.f32.vlgmr.msra.gmra.mxu2 %vm175_vm8, %v1485_v42 }
 0xedc   :  { %1779 = vmatpush.msrb.mxu1 %v2024_v53  ;;  %v1860_v53 = vld [vmem:[%s2890_s16 + $0x10] sm:$0xff] }
 0xee6   :  { %v1227_v43 = vpop.f32.mrf.mxu2 }
 0xee7   :  { %1302 = vrot.lane.b32.xlu0 %v1227_v43, %s2936_s25  ;;  %v2023_v43 = vld [vmem:[%s2886_s12 + $0x68] sm:$0xff] }
 0xee8   :  { %1780 = vmatpush.msrb.mxu1 %v2023_v43 }
 0xee9   :  { %v1554_v46 = vpop.permute.xlu1 %1553 }
 0xeea   :  { %1574 = vmatpush.msrb.mxu3 %v1554_v46  ;;  %v2021_v46 = vld [vmem:[%s2886_s12 + $0x58] sm:$0xff] }
 0xeeb   :  { %2001 = vmatmul.msk.f32.vlgmr.msrb.gmra.mxu3 %vm175_vm8, %v1552_v45  ;;  %v2022_v45 = vld [vmem:[%s2886_s12 + $0x60] sm:$0xff] }
 0xeec   :  { %1781 = vmatpush.msrb.mxu1 %v2022_v45  ;;  %v1859_v45 = vld [vmem:[%s2890_s16 + $0x8] sm:$0xff] }
 0xeee   :  { %v1375_v49 = vpop.f32.mrf.mxu2  ;;  %1782 = vmatpush.msrb.mxu1 %v2021_v46  ;;  %v1858_v46 = vld [vmem:[%s2890_s16] sm:$0xff] }
 0xeef   :  { %1580 = vrot.lane.b32.xlu0 %v1442_v48, %s2934_s4  ;;  %v2020_v48 = vld [vmem:[%s2886_s12 + $0x50] sm:$0xff] }
 0xef0   :  { %1783 = vmatpush.msrb.mxu1 %v2020_v48 }
 0xf59   :  { %v1303_v54 = vpop.permute.xlu0 %1302 }
 0xf5a   :  { %v1310_v55 = vsel %vm454_vm9, %v1309_v51, %v1303_v54  ;;  %v2018_v54 = vld [vmem:[%s2886_s12 + $0x40] sm:$0xff] }
 0xf5b   :  { %v1311_v56 = vsel %vm456_vm10, %v1310_v55, %v1307_v18 }
 0xf5c   :  { %2007 = vmatmul.msk.f32.vlgmr.msrb.gmra.mxu0 %vm70_vm0, %v1311_v56 }
 0xf5e   :  { %v1509_v57 = vpop.f32.mrf.mxu2 }
 0xf5f   :  { %1584 = vrot.lane.b32.xlu2 %v1509_v57, %s2936_s25 }
 0xf61   :  { %v1581_v59 = vpop.permute.xlu0 %1580 }
 0xf62   :  { %v1591_v5 = vsel %vm175_vm8, %v1375_v49, %v1581_v59  ;;  %v2019_v49 = vld [vmem:[%s2886_s12 + $0x48] sm:$0xff] }
 0xf63   :  { %1784 = vmatpush.msrb.mxu1 %v2019_v49 }
 0xf65   :  { %1785 = vmatpush.msrb.mxu1 %v2018_v54 }
 0xf6e   :  { %v1576_v41 = vpop.f32.mrf.mxu3 }
 0xf6f   :  { %1588 = vrot.lane.b32.xlu0 %v1576_v41, %s2935_s2  ;;  %v2063_v41 = vld [vmem:[%s2885_s11 + $0x1] ss:$0 sm:$0xff] }
 0xfb9   :  { %v1585_v2 = vpop.permute.xlu2 %1584 }
 0xfba   :  { %v1592_v6 = vsel %vm454_vm9, %v1591_v5, %v1585_v2 }
 0xfd9   :  { %v1627_v62 = vpop.f32.mrf.mxu0 }
 0xfda   :  { %v1628_v60 = vadd.f32 %v2060_v58, %v1627_v62 }
 0xfdc   :  { %v1633_v61 = vadd.f32 %v1628_v60, %v2609_v3 }
 0xfde   :  { %v1639_v4 = vsel %vm70_vm0, %v1633_v61, 0.0 }
 0xfdf   :  { %1640 = vadd.xlane.f32.xlu1 %v1639_v4 }
 0xfe1   :  { %v1589_v7 = vpop.permute.xlu0 %1588 }
 0xfe2   :  { %v1593_v9 = vsel %vm456_vm10, %v1592_v6, %v1589_v7 }
 0xfe3   :  { %2008 = vmatmul.msk.f32.gmra.mxu0 %vm70_vm0, %v1593_v9 }
0x1052   :  { %v1641_v11 = vpop.xlane.xlu1 %1640 }
0x1053   :  { %v1645_v35 = vmul.f32 %v1641_v11, %v2320_v10 }
0x1055   :  { %v1647_v12 = vsub.f32 %v1633_v61, %v1645_v35 }
0x1057   :  { %v1649_v13 = vmul.f32 %v1647_v12, %v1647_v12 }
0x1059   :  { %v1651_v3 = vsel %vm70_vm0, %v1649_v13, 0.0 }
0x105a   :  { %1652 = vadd.xlane.f32.xlu0 %v1651_v3 }
0x1060   :  { %v1630_v14 = vpop.f32.mrf.mxu0 }
0x1061   :  { %v1631_v15 = vadd.f32 %v2060_v58, %v1630_v14 }
0x1063   :  { %v1634_v16 = vadd.f32 %v1631_v15, %v2650_v47  ;;  %v2011_v47 = vld [vmem:[%s2884_s10 + $0x20] sm:$0xff]  ;;  %s2206_s10 = smov [#allocation2]  }
0x1064   :  { %1724 = vmatpush.msrb.mxu2 %v2011_v47  ;;  %s1928_s11 = sshll.u32 %s2206_s10, 4  ;;  %s1929_s11 = int_to_ptr.vmem [resolvable:$true] %s1928_s11 }
0x1065   :  { %v1642_v8 = vsel %vm70_vm0, %v1634_v16, 0.0 }
0x1066   :  { %1643 = vadd.xlane.f32.xlu2 %v1642_v8 }
0x10cd   :  { %v1653_v20 = vpop.xlane.xlu0 %1652 }
0x10ce   :  { %v1657_v21 = vmul.f32 %v1653_v20, %v2320_v10 }
0x10d0   :  { %v1659_v22 = vadd.f32 1e-12, %v1657_v21 }
0x10d2   :  { %2151 = vrsqrt.f32 %v1659_v22  ;;  %vm1667_vm9 = vweird.f32 %v1659_v22 }
0x10d8   :  { %v2152_v63 = vpop.eup %2151 }
0x10d9   :  { %v1662_v52 = vmul.f32 %v2152_v63, %v1659_v22  ;;  %v1644_v23 = vpop.xlane.xlu2 %1643  ;;  %vm1668_vm8 = vweird.f32 %v2152_v63 }
0x10da   :  { %v1646_v17 = vmul.f32 %v1644_v23, %v2320_v10  ;;  %vm1669_vm10 = vmor %vm1667_vm9, %vm1668_vm8 }
0x10db   :  { %v1663_v24 = vmul.f32 %v2152_v63, %v1662_v52 }
0x10dc   :  { %v1648_v25 = vsub.f32 %v1634_v16, %v1646_v17 }
0x10dd   :  { %v1664_v26 = vmul.f32 0.5, %v1663_v24 }
0x10de   :  { %v1650_v27 = vmul.f32 %v1648_v25, %v1648_v25 }
0x10df   :  { %v1665_v28 = vsub.f32 1.5, %v1664_v26 }
0x10e0   :  { %v1654_v29 = vsel %vm70_vm0, %v1650_v27, 0.0 }
0x10e1   :  { %v1666_v30 = vmul.f32 %v2152_v63, %v1665_v28  ;;  %1655 = vadd.xlane.f32.xlu2 %v1654_v29 }
0x10e3   :  { %v1670_v32 = vsel %vm1669_vm10, %v2152_v63, %v1666_v30 }
0x10e4   :  { %v1681_v1 = vmul.f32 %v1670_v32, %v1647_v12 }
0x10e6   :  { %v1686_v34 = vmul.f32 %v2061_v31, %v1681_v1 }
0x10e8   :  { %v1691_v36 = vadd.f32 %v2062_v33, %v1686_v34 }
0x10ea   :  { %2016 = vmatmul.msk.f32.vlgmr.msrb.gmra.mxu2 %vm70_vm0, %v1691_v36 }
0x1154   :  { %v1656_v37 = vpop.xlane.xlu2 %1655 }
0x1155   :  { %v1658_v38 = vmul.f32 %v1656_v37, %v2320_v10 }
0x1157   :  { %v1660_v42 = vadd.f32 1e-12, %v1658_v38 }
0x1159   :  { %2153 = vrsqrt.f32 %v1660_v42  ;;  %vm1677_vm13 = vweird.f32 %v1660_v42 }
0x115f   :  { %v2154_v40 = vpop.eup %2153 }
0x1160   :  { %v1672_v44 = vmul.f32 %v2154_v40, %v1660_v42  ;;  %vm1678_vm12 = vweird.f32 %v2154_v40  ;;  %v1861_v42 = vld [vmem:[%s2890_s16 + $0x18] sm:$0xff] }
0x1161   :  { %vm1679_vm15 = vmor %vm1677_vm13, %vm1678_vm12  ;;  %1881 = vmatpush.msra.mxu3 %v1861_v42 }
0x1162   :  { %v1673_v51 = vmul.f32 %v2154_v40, %v1672_v44 }
0x1163   :  { %1882 = vmatpush.msra.mxu3 %v1860_v53 }
0x1164   :  { %v1674_v18 = vmul.f32 0.5, %v1673_v51 }
0x1165   :  { %1883 = vmatpush.msra.mxu3 %v1859_v45 }
0x1166   :  { %v1675_v55 = vsub.f32 1.5, %v1674_v18 }
0x1167   :  { %1884 = vmatpush.msra.mxu3 %v1858_v46 }
0x1168   :  { %v1676_v56 = vmul.f32 %v2154_v40, %v1675_v55 }
0x116a   :  { %v1680_v57 = vsel %vm1679_vm15, %v2154_v40, %v1676_v56 }
0x116b   :  { %v1682_v58 = vmul.f32 %v1680_v57, %v1648_v25 }
0x116d   :  { %v1726_v59 = vpop.f32.mrf.mxu2  ;;  %v1687_v62 = vmul.f32 %v2061_v31, %v1682_v58 }
0x116e   :  { %v1727_v60 = vadd.f32 %v2063_v41, %v1726_v59 }
0x116f   :  { %v1692_v61 = vadd.f32 %v2062_v33, %v1687_v62 }
0x1170   :  { %v1734_v2 = vmul.f32 0.044715, %v1727_v60  ;;  %v1732_v11 = vmul.f32 0.5, %v1727_v60 }
0x1171   :  { %2017 = vmatmul.msk.f32.gmra.mxu2 %vm70_vm0, %v1692_v61 }
0x1172   :  { %v1736_v4 = vmul.f32 %v1734_v2, %v1727_v60 }
0x1174   :  { %v1738_v5 = vmul.f32 %v1736_v4, %v1727_v60 }
0x1176   :  { %v1740_v6 = vadd.f32 %v1738_v5, %v1727_v60 }
0x1178   :  { %v1742_v7 = vmul.f32 0.7978846, %v1740_v6 }
0x117a   :  { %2155 = vtanh.f32 %v1742_v7  ;;  %v2066_v7 = vld [vmem:[%s2889_s15 + $0x1] ss:$0 sm:$0xff] }
0x1180   :  { %v2156_v9 = vpop.eup %2155 }
0x1181   :  { %v1746_v35 = vadd.f32 1.0, %v2156_v9 }
0x1183   :  { %v1748_v12 = vmul.f32 %v1746_v35, %v1732_v11 }
0x1185   :  { %2027 = vmatmul.msk.f32.vlgmr.msrb.gmra.mxu1 %vm903_vm14, %v1748_v12 }
0x11f4   :  { %v1729_v13 = vpop.f32.mrf.mxu2 }
0x11f5   :  { %v1730_v3 = vadd.f32 %v2063_v41, %v1729_v13  ;;  %v1893_v13 = vld [vmem:[%s2892_s18 + $0x18] sm:$0xff] }
0x11f6   :  { %1913 = vmatpush.msrb.mxu3 %v1893_v13 }
0x11f7   :  { %v1735_v14 = vmul.f32 0.044715, %v1730_v3  ;;  %v1733_v63 = vmul.f32 0.5, %v1730_v3 }
0x11f9   :  { %v1737_v15 = vmul.f32 %v1735_v14, %v1730_v3  ;;  %v1891_v14 = vld [vmem:[%s2892_s18 + $0x8] sm:$0xff] }
0x11fb   :  { %v1739_v16 = vmul.f32 %v1737_v15, %v1730_v3  ;;  %v1890_v15 = vld [vmem:[%s2892_s18] sm:$0xff] }
0x11fd   :  { %v1741_v8 = vadd.f32 %v1739_v16, %v1730_v3  ;;  %v1892_v3 = vld [vmem:[%s2892_s18 + $0x10] sm:$0xff]  ;;  %v2067_v16 = vld [vmem:[%s2891_s17] ss:$0 sm:$0xff] }
0x11fe   :  { %1914 = vmatpush.msrb.mxu3 %v1892_v3 }
0x11ff   :  { %v1743_v0 = vmul.f32 0.7978846, %v1741_v8 }
0x1200   :  { %1915 = vmatpush.msrb.mxu3 %v1891_v14 }
0x1201   :  { %2157 = vtanh.f32 %v1743_v0 }
0x1202   :  { %v1787_v19 = vpop.f32.mrf.mxu1  ;;  %1916 = vmatpush.msrb.mxu3 %v1890_v15 }
0x1203   :  { %v1788_v47 = vadd.f32 %v2064_v50, %v1787_v19  ;;  %v2068_v19 = vld [vmem:[%s2893_s19] ss:$0 sm:$0xff] }
0x1205   :  { %v1793_v20 = vadd.f32 %v1788_v47, %v1691_v36 }
0x1207   :  { %v2158_v21 = vpop.eup %2157  ;;  %v1799_v22 = vsel %vm70_vm0, %v1793_v20, 0.0 }
0x1208   :  { %1800 = vadd.xlane.f32.xlu0 %v1799_v22  ;;  %v1747_v52 = vadd.f32 1.0, %v2158_v21 }
0x120a   :  { %v1749_v23 = vmul.f32 %v1747_v52, %v1733_v63 }
0x120c   :  { %2028 = vmatmul.msk.f32.gmra.mxu1 %vm903_vm14, %v1749_v23 }
0x127b   :  { %v1801_v17 = vpop.xlane.xlu0 %1800 }
0x127c   :  { %v1805_v25 = vmul.f32 %v1801_v17, %v2320_v10 }
0x127e   :  { %v1807_v28 = vsub.f32 %v1793_v20, %v1805_v25 }
0x1280   :  { %v1809_v30 = vmul.f32 %v1807_v28, %v1807_v28 }
0x1282   :  { %v1811_v31 = vsel %vm70_vm0, %v1809_v30, 0.0 }
0x1289   :  { %v1790_v24 = vpop.f32.mrf.mxu1 }
0x128a   :  { %v1791_v26 = vadd.f32 %v2064_v50, %v1790_v24 }
0x128c   :  { %v1794_v27 = vadd.f32 %v1791_v26, %v1692_v61 }
0x128e   :  { %v1802_v29 = vsel %vm70_vm0, %v1794_v27, 0.0 }
0x128f   :  { %1803 = vadd.xlane.f32.xlu1 %v1802_v29 }
0x1297   :  { %1812 = vadd.xlane.f32.xlu1 %v1811_v31 }
0x1302   :  { %v1804_v32 = vpop.xlane.xlu1 %1803 }
0x1303   :  { %v1806_v1 = vmul.f32 %v1804_v32, %v2320_v10 }
0x1305   :  { %v1808_v33 = vsub.f32 %v1794_v27, %v1806_v1 }
0x1307   :  { %v1810_v34 = vmul.f32 %v1808_v33, %v1808_v33 }
0x1309   :  { %v1814_v36 = vsel %vm70_vm0, %v1810_v34, 0.0 }
0x130a   :  { %1815 = vadd.xlane.f32.xlu2 %v1814_v36  ;;  %v1813_v37 = vpop.xlane.xlu1 %1812 }
0x130b   :  { %v1817_v38 = vmul.f32 %v1813_v37, %v2320_v10 }
0x130d   :  { %v1819_v39 = vadd.f32 1e-12, %v1817_v38 }
0x130f   :  { %2159 = vrsqrt.f32 %v1819_v39  ;;  %vm1827_vm1 = vweird.f32 %v1819_v39 }
0x1315   :  { %v2160_v43 = vpop.eup %2159 }
0x1316   :  { %v1822_v48 = vmul.f32 %v2160_v43, %v1819_v39  ;;  %vm1828_vm14 = vweird.f32 %v2160_v43 }
0x1317   :  { %vm1829_vm2 = vmor %vm1827_vm1, %vm1828_vm14 }
0x1318   :  { %v1823_v49 = vmul.f32 %v2160_v43, %v1822_v48 }
0x131a   :  { %v1824_v54 = vmul.f32 0.5, %v1823_v49 }
0x131c   :  { %v1825_v18 = vsub.f32 1.5, %v1824_v54 }
0x131e   :  { %v1826_v57 = vmul.f32 %v2160_v43, %v1825_v18 }
0x1320   :  { %v1830_v59 = vsel %vm1829_vm2, %v2160_v43, %v1826_v57 }
0x1321   :  { %v1841_v61 = vmul.f32 %v1830_v59, %v1807_v28 }
0x137d   :  { %v1816_v40 = vpop.xlane.xlu2 %1815 }
0x137e   :  { %v1818_v44 = vmul.f32 %v1816_v40, %v2320_v10  ;;  %v2065_v10 = vld [vmem:[%s2888_s14 + $0x1] ss:$0 sm:$0xff] }
0x137f   :  { %v1846_v5 = vmul.f32 %v2065_v10, %v1841_v61 }
0x1380   :  { %v1820_v51 = vadd.f32 1e-12, %v1818_v44 }
0x1381   :  { %v1851_v11 = vadd.f32 %v2066_v7, %v1846_v5 }
0x1382   :  { %2161 = vrsqrt.f32 %v1820_v51  ;;  %vm1837_vm4 = vweird.f32 %v1820_v51 }
0x1388   :  { %v2162_v55 = vpop.eup %2161 }
0x1389   :  { %v1832_v56 = vmul.f32 %v2162_v55, %v1820_v51  ;;  %vm1838_vm3 = vweird.f32 %v2162_v55 }
0x138a   :  { %vm1839_vm5 = vmor %vm1837_vm4, %vm1838_vm3 }
0x138b   :  { %v1833_v41 = vmul.f32 %v2162_v55, %v1832_v56 }
0x138d   :  { %v1834_v58 = vmul.f32 0.5, %v1833_v41 }
0x138f   :  { %v1835_v62 = vsub.f32 1.5, %v1834_v58 }
0x1391   :  { %v1836_v60 = vmul.f32 %v2162_v55, %v1835_v62 }
0x1393   :  { %v1840_v2 = vsel %vm1839_vm5, %v2162_v55, %v1836_v60 }
0x1394   :  { %v1842_v4 = vmul.f32 %v1840_v2, %v1808_v33 }
0x1396   :  { %v1847_v6 = vmul.f32 %v2065_v10, %v1842_v4 }
0x1398   :  { %v1852_v9 = vadd.f32 %v2066_v7, %v1847_v6 }
0x139a   :  { %v1854_v35 = vrot.slane %v1852_v9, 7 }
0x139c   :  { %v1857_v12 = vsel %vm1856_vm6, %v1851_v11, %v1854_v35 }
0x139d   :  { %2031 = vmatmul.msk.f32.vlgmr.msra.gmra.mxu3 %vm70_vm0, %v1857_v12 }
0x1420   :  { %v1886_v8 = vpop.f32.mrf.mxu3 }
0x1421   :  { %v1887_v50 = vadd.f32 %v2067_v16, %v1886_v8 }
0x1423   :  { %2163 = vtanh.f32 %v1887_v50 }
0x1429   :  { %v2164_v0 = vpop.eup %2163 }
0x142a   :  { %2032 = vmatmul.msk.f32.vlgmr.msrb.gmra.mxu3 %vm70_vm0, %v2164_v0 }
0x14ad   :  { %v1918_v47 = vpop.f32.mrf.mxu3 }
0x14ae   :  { %v1919_v20 = vadd.f32 %v2068_v19, %v1918_v47 }
0x14b0   :  { %1922 = vst.msk [vmem:[#allocation2] sm:$0x3] %vm1921_vm7, %v1919_v20 }
0x14b1   :  { %1933 = dma.vmem_to_hbm [thread:$0]  %s1929_s11, 32, %s1931_s13, [#allocation3]  }
0x14b2   :  { %2189 = dma.done.wait [#allocation3], 32  }
0x14b3   :  { %2190 = vsyncadd [#allocation3], 4294967264 }
0x14b4   :  { %1938 = vsyncpa [#allocation3], 1 }

</bundles_post_ra>
